<compile_context>
chip_gen: v7x
topology: tpu7x:2x2x1
jax: 0.10.0
libtpu: 0.0.40
codegen_flags: <defaults>
</compile_context>

<pallas_src>
import jax
import jax.numpy as jnp
from jax.experimental import pallas as pl
from jax.experimental.pallas import tpu as pltpu

_LANES = 128
_SUBLANE_ATOMS = 1024          # multiple of 1024 atoms -> E/F/S row-blocks are multiples of 8
_FAST_PATH_ATOMS = 1024        # below this, plain jnp beats a pallas launch
_TARGET_GRID_STEPS = 4         # keep the pipeline (and both v7x TCs) busy
_MAX_TILE_ATOMS_DENSE = 131072  # ~21 MiB of double-buffered in+out VMEM (dense layout)
_MAX_TILE_ATOMS_LANE = 32768    # ~40 MiB worst case with 8x sublane padding (1-row layout)
_VMEM_LIMIT_BYTES = 48 * 1024 * 1024


def _round_up(x: int, m: int) -> int:
    return ((x + m - 1) // m) * m


def _rescale_kernel(params_ref, e_ref, f_ref, s_ref, eo_ref, fo_ref, so_ref):
    # params (SMEM): [scale_force, shift, sqrt(scale_stress)]
    scale_force = params_ref[0]
    shift = params_ref[1]
    sqrt_scale_stress = params_ref[2]
    # Pure VPU elementwise work; trivially HBM-bandwidth bound.
    eo_ref[...] = e_ref[...] * scale_force + shift
    fo_ref[...] = f_ref[...] * scale_force
    so_ref[...] = s_ref[...] * sqrt_scale_stress


def _pallas_rescale(params, e, f, s, n):
    """Single-pass rescale of e [N,1], f [N,3], s [N,6] (all float32)."""
    if n % _LANES == 0:
        # Fully dense [rows, 128] views (free reshapes since n*c % 128 == 0).
        tile = min(
            _MAX_TILE_ATOMS_DENSE,
            max(_SUBLANE_ATOMS,
                _round_up(pl.cdiv(n, _TARGET_GRID_STEPS), _SUBLANE_ATOMS)))

        def view(x, c):
            return x.reshape(n * c // _LANES, _LANES)

        def spec(c):
            return pl.BlockSpec((tile * c // _LANES, _LANES), lambda i: (i, 0))
    else:
        # General case: [1, n*c] views (metadata-only), ragged last block.
        tile = min(
            _MAX_TILE_ATOMS_LANE,
            max(_LANES, _round_up(pl.cdiv(n, _TARGET_GRID_STEPS), _LANES)))

        def view(x, c):
            return x.reshape(1, n * c)

        def spec(c):
            return pl.BlockSpec((1, tile * c), lambda i: (0, i))

    grid = (pl.cdiv(n, tile),)
    views = (view(e, 1), view(f, 3), view(s, 6))

    e_o, f_o, s_o = pl.pallas_call(
        _rescale_kernel,
        grid=grid,
        in_specs=[
            pl.BlockSpec(memory_space=pltpu.MemorySpace.SMEM),  # params scalars
            spec(1), spec(3), spec(6),
        ],
        out_specs=(spec(1), spec(3), spec(6)),
        out_shape=tuple(
            jax.ShapeDtypeStruct(v.shape, jnp.float32) for v in views),
        compiler_params=pltpu.CompilerParams(
            dimension_semantics=("parallel",),
            vmem_limit_bytes=_VMEM_LIMIT_BYTES),
    )(params, *views)

    return e_o.reshape(n, 1), f_o.reshape(n, 3), s_o.reshape(n, 6)


@jax.jit
def _rescale_jit(scaled_energy, scaled_force, scaled_stress,
                 shift, scale_force, scale_stress):
    n = scaled_energy.shape[0]
    assert scaled_energy.shape == (n, 1)
    assert scaled_force.shape == (n, 3)
    assert scaled_stress.shape == (n, 6)

    e = scaled_energy.astype(jnp.float32)
    f = scaled_force.astype(jnp.float32)
    s = scaled_stress.astype(jnp.float32)

    scale_force = jnp.asarray(scale_force, jnp.float32).reshape(())
    shift = jnp.asarray(shift, jnp.float32).reshape(())
    sqrt_ss = jnp.sqrt(jnp.asarray(scale_stress, jnp.float32)).reshape(())

    if n <= _FAST_PATH_ATOMS:
        # Tiny systems: let XLA fuse this with neighbors; no kernel launch.
        return e * scale_force + shift, f * scale_force, s * sqrt_ss

    params = jnp.stack([scale_force, shift, sqrt_ss])
    return _pallas_rescale(params, e, f, s, n)


def rescale(scaled_energy, scaled_force, scaled_stress,
            shift, scale_force, scale_stress):
    """Apply Rescale to per-atom energy [N,1], force [N,3], stress [N,6].

    shift / scale_force / scale_stress may be Python floats or JAX scalars;
    they are passed as runtime values (SMEM scalars in the kernel), so changing
    them never triggers a recompile (train_shift_scale-friendly).
    """
    return _rescale_jit(scaled_energy, scaled_force, scaled_stress,
                        shift, scale_force, scale_stress)


if __name__ == "__main__":
    key = jax.random.PRNGKey(0)

    # Deterministic "parameters" (module __init__ args).
    shift = -3.5
    scale = {"force": 1.7, "stress": 0.25}

    # N=4100: general Pallas path with a ragged trailing block.
    # N=4096: fully lane/sublane-dense Pallas path.
    # N=16  : small-system plain-jnp fast path.
    for n_atoms in (4100, 4096, 16):
        key, k_e, k_f, k_s = jax.random.split(key, 4)
        scaled_energy = jax.random.normal(k_e, (n_atoms, 1), dtype=jnp.float32)
        scaled_force = jax.random.normal(k_f, (n_atoms, 3), dtype=jnp.float32)
        scaled_stress = jax.random.normal(k_s, (n_atoms, 6), dtype=jnp.float32)

        e_out, f_out, s_out = rescale(
            scaled_energy, scaled_force, scaled_stress,
            shift, scale["force"], scale["stress"])
        jax.block_until_ready((e_out, f_out, s_out))

        # Pure-JAX reference check.
        e_ref = scaled_energy * scale["force"] + shift
        f_ref = scaled_force * scale["force"]
        s_ref = scaled_stress * (scale["stress"] ** 0.5)
        assert e_out.shape == e_ref.shape
        assert f_out.shape == f_ref.shape
        assert s_out.shape == s_ref.shape
        assert jnp.allclose(e_out, e_ref, atol=1e-6)
        assert jnp.allclose(f_out, f_ref, atol=1e-6)
        assert jnp.allclose(s_out, s_ref, atol=1e-6)

    print("KERNEL_OK")
</pallas_src>

<mosaic_0001>
module attributes {stable_mosaic.version = 11 : i64} {
  func.func @_rescale_kernel(%arg0: i32, %arg1: memref<3xf32, #tpu.memory_space<smem>>, %arg2: memref<1x1152xf32, #tpu.memory_space<vmem>>, %arg3: memref<1x3456xf32, #tpu.memory_space<vmem>>, %arg4: memref<1x6912xf32, #tpu.memory_space<vmem>>, %arg5: memref<1x1152xf32, #tpu.memory_space<vmem>>, %arg6: memref<1x3456xf32, #tpu.memory_space<vmem>>, %arg7: memref<1x6912xf32, #tpu.memory_space<vmem>>) attributes {dimension_semantics = [#tpu.dimension_semantics<parallel>], iteration_bounds = array<i64: 4>, scalar_prefetch = 0 : i64, scratch_operands = 0 : i64, tpu.core_type = #tpu.core_type<tc>, window_params = [{transform_indices = @transform_0, window_bounds = array<i64: 3>}, {transform_indices = @transform_1, window_bounds = array<i64: 1, 1152>}, {transform_indices = @transform_2, window_bounds = array<i64: 1, 3456>}, {transform_indices = @transform_3, window_bounds = array<i64: 1, 6912>}, {transform_indices = @transform_4, window_bounds = array<i64: 1, 1152>}, {transform_indices = @transform_5, window_bounds = array<i64: 1, 3456>}, {transform_indices = @transform_6, window_bounds = array<i64: 1, 6912>}]} {
    %c0 = arith.constant 0 : index
    %0 = memref.load %arg1[%c0] : memref<3xf32, #tpu.memory_space<smem>>
    %c1 = arith.constant 1 : index
    %1 = memref.load %arg1[%c1] : memref<3xf32, #tpu.memory_space<smem>>
    %c2 = arith.constant 2 : index
    %2 = memref.load %arg1[%c2] : memref<3xf32, #tpu.memory_space<smem>>
    %c0_0 = arith.constant 0 : index
    %c0_1 = arith.constant 0 : index
    %3 = vector.load %arg2[%c0_0, %c0_1] : memref<1x1152xf32, #tpu.memory_space<vmem>>, vector<1x1152xf32>
    %4 = vector.broadcast %0 : f32 to vector<1x1152xf32>
    %5 = arith.mulf %3, %4 : vector<1x1152xf32>
    %6 = vector.broadcast %1 : f32 to vector<1x1152xf32>
    %7 = arith.addf %5, %6 : vector<1x1152xf32>
    %c0_2 = arith.constant 0 : index
    %c0_3 = arith.constant 0 : index
    %8 = vector.load %arg5[%c0_2, %c0_3] : memref<1x1152xf32, #tpu.memory_space<vmem>>, vector<1x1152xf32>
    tpu.vector_store %arg5[%c0_2, %c0_3], %7 {strides = array<i32>} : memref<1x1152xf32, #tpu.memory_space<vmem>>, vector<1x1152xf32>,
    %c0_4 = arith.constant 0 : index
    %c0_5 = arith.constant 0 : index
    %9 = vector.load %arg3[%c0_4, %c0_5] : memref<1x3456xf32, #tpu.memory_space<vmem>>, vector<1x3456xf32>
    %10 = vector.broadcast %0 : f32 to vector<1x3456xf32>
    %11 = arith.mulf %9, %10 : vector<1x3456xf32>
    %c0_6 = arith.constant 0 : index
    %c0_7 = arith.constant 0 : index
    %12 = vector.load %arg6[%c0_6, %c0_7] : memref<1x3456xf32, #tpu.memory_space<vmem>>, vector<1x3456xf32>
    tpu.vector_store %arg6[%c0_6, %c0_7], %11 {strides = array<i32>} : memref<1x3456xf32, #tpu.memory_space<vmem>>, vector<1x3456xf32>,
    %c0_8 = arith.constant 0 : index
    %c0_9 = arith.constant 0 : index
    %13 = vector.load %arg4[%c0_8, %c0_9] : memref<1x6912xf32, #tpu.memory_space<vmem>>, vector<1x6912xf32>
    %14 = vector.broadcast %2 : f32 to vector<1x6912xf32>
    %15 = arith.mulf %13, %14 : vector<1x6912xf32>
    %c0_10 = arith.constant 0 : index
    %c0_11 = arith.constant 0 : index
    %16 = vector.load %arg7[%c0_10, %c0_11] : memref<1x6912xf32, #tpu.memory_space<vmem>>, vector<1x6912xf32>
    tpu.vector_store %arg7[%c0_10, %c0_11], %15 {strides = array<i32>} : memref<1x6912xf32, #tpu.memory_space<vmem>>, vector<1x6912xf32>,
    return
  }
  func.func @transform_0(%arg0: i32) -> i32 {
    %c0_i32 = arith.constant 0 : i32
    %c0_i32_0 = arith.constant 0 : i32
    return %c0_i32 : i32
  }
  func.func @transform_1(%arg0: i32) -> (i32, i32) {
    %c0_i32 = arith.constant 0 : i32
    %c0_i32_0 = arith.constant 0 : i32
    return %c0_i32, %arg0 : i32, i32
  }
  func.func @transform_2(%arg0: i32) -> (i32, i32) {
    %c0_i32 = arith.constant 0 : i32
    %c0_i32_0 = arith.constant 0 : i32
    return %c0_i32, %arg0 : i32, i32
  }
  func.func @transform_3(%arg0: i32) -> (i32, i32) {
    %c0_i32 = arith.constant 0 : i32
    %c0_i32_0 = arith.constant 0 : i32
    return %c0_i32, %arg0 : i32, i32
  }
  func.func @transform_4(%arg0: i32) -> (i32, i32) {
    %c0_i32 = arith.constant 0 : i32
    %c0_i32_0 = arith.constant 0 : i32
    return %c0_i32, %arg0 : i32, i32
  }
  func.func @transform_5(%arg0: i32) -> (i32, i32) {
    %c0_i32 = arith.constant 0 : i32
    %c0_i32_0 = arith.constant 0 : i32
    return %c0_i32, %arg0 : i32, i32
  }
  func.func @transform_6(%arg0: i32) -> (i32, i32) {
    %c0_i32 = arith.constant 0 : i32
    %c0_i32_0 = arith.constant 0 : i32
    return %c0_i32, %arg0 : i32, i32
  }
}

</mosaic_0001>

<bundles_post_ra>
// kernel: _rescale_jit.1
= control target key start
LH: loop header
LB: loop body
LE: loop exit
PB: predicated region body
PF: predicated region fallthrough
CT: control target
= control target key end

     0   :  { %s3363_s0 = inlined_call_operand.vmem [shape: f32[3], index: 0, kind: input, shape index: {}]   ;;  %s3364_s1 = inlined_call_operand.vmem [shape: f32[1,4100], index: 1, kind: input, shape index: {}]   ;;  %s3365_s2 = inlined_call_operand.vmem [shape: f32[1,12300], index: 2, kind: input, shape index: {}]   ;;  %s3366_s3 = inlined_call_operand.vmem [shape: f32[1,24600], index: 3, kind: input, shape index: {}]   ;;  %s3367_s4 = inlined_call_operand.hbm [shape: f32[1,4100], index: 4, kind: output, shape index: {0}]   ;;  %s3368_s5 = inlined_call_operand.vmem [shape: f32[1,12300], index: 5, kind: output, shape index: {1}]   ;;  %s3369_s6 = inlined_call_operand.vmem [shape: f32[1,24600], index: 6, kind: output, shape index: {2}]  }
   0x1   :  { %3371 = sst [smem:[#allocation10_spill]] %s3363_s0 }
   0x2   :  { %3372 = sst [smem:[#allocation11_spill]] %s3364_s1 }
   0x3   :  { %3373 = sst [smem:[#allocation12_spill]] %s3365_s2 }
   0x4   :  { %3374 = sst [smem:[#allocation13_spill]] %s3366_s3 }
   0x5   :  { %3375 = sst [smem:[#allocation14_spill]] %s3367_s4 }
   0x6   :  { %12 = vsyncpa [#allocation4], 0 }
   0x7   :  { %13 = vsyncpa [#allocation3], 0 }
   0x8   :  { %15 = vsyncpa [#allocation3 + $0x1], 0  ;;  %s2358_s21 = smov 0   ;;  %s2360_s22 = smov 0  }
   0x9   :  { %s2362_s23 = smov 0   ;;  %s2364_s24 = smov 0  }
   0xa LB: > { %s2379_s25 = sadd.s32 4294967295, %s2187_s24   ;;  %s1598_s26 = sadd.s32 4294967294, %s2187_s24   ;;  %s2187_s24 = sphi %s2364_s24, %s3413_s24   ;;  %s2183_s23 = sphi %s2362_s23, %s3412_s23   ;;  %s2179_s22 = sphi %s2360_s22, %s3411_s22   ;;  %s2175_s21 = sphi %s2358_s21, %s3410_s21  }
   0xb   : > { %s2383_s27 = sadd.s32 1, %s2187_s24   ;;  %s127_s28 = sadd.s32 1, %s2183_s23 }
   0xc   : > { %s124_s29 = ssub.s32 %s2187_s24, %s2383_s27  ;;  %p137_p0 = scmp.ne.s32.totalorder %s2183_s23, %s2179_s22 }
   0xd   : > { %p125_p1 = scmp.eq.s32.totalorder %s124_s29, 0  ;;  %p138_p2 = scmp.eq.s32.totalorder %s2379_s25, 3 }
   0xe   : > { %p143_p3 = scmp.ne.s32.totalorder %s2179_s22, %s2175_s21  ;;  %p144_p4 = scmp.eq.s32.totalorder %s1598_s26, 3 }
   0xf   : > { %s2394_s30 = scalar_select %p125_p1, %s2183_s23, %s127_s28  }
  0x10   : > { %p2396_p5 = por %p138_p2, %p137_p0  ;;  %p2400_p6 = por %p144_p4, %p143_p3 }
  0x11   : > { %p1599_p7 = scmp.ge.s32.totalorder %s2187_s24, 1  ;;  %p203_p8 = scmp.lt.s32.totalorder %s2187_s24, 5 }
  0x12   : > { %p1682_p9 = scmp.eq.s32.totalorder %s2379_s25, 0  ;;  %s3379_s0 = sld [smem:[#allocation10_spill]] }
  0x13   : > { %p2407_p10 = pnand %p1599_p7, %p203_p8 }
  0x15   : > { %p1674_p11 = pneg %p2407_p10 }
  0x17   : > { %p1675_p12 = pnand %p1682_p9, %p1674_p11 }
  0x18   : > { %s216_s12 = sshll.u32 %s3379_s0, 4  ;;  %s217_s12 = int_to_ptr.vmem [resolvable:$true] %s216_s12 }
  0x19   : > { %s1978_s13 = scalar_lea.vmem %s217_s12, 16  ;;  %p1980_p0 = pneg %p1675_p12 }
  0x1a   : > { %p1979_p13 = scmp.ne.s32.totalorder %s217_s12, %s1978_s13  ;;  %p1986_p3 = scmp.lt.s32.totalorder %s217_s12, %s217_s12 }
  0x1b   : > { %p1987_p4 = scmp.lt.s32.totalorder %s1978_s13, %s1978_s13 }
  0x1c   : > { %p1981_p1 = pnand %p1980_p0, %p1979_p13 }
  0x1d   : > { %p1988_p7 = por %p1987_p4, %p1986_p3 }
  0x1e   : > { %p1982_p2 = pneg %p1981_p1 }
  0x20   : > { %p1989_p8 = pnand %p1988_p7, %p1982_p2 }
  0x22   : > { %1992 = shalt.err (!%p1989_p8)
}
  0x23   : > { %s2317_s14 = smov [#allocation2]   ;;  %277 = sbr.rel (%p2407_p10) target bundleno = 440 (0x1b8), region = 36 }
  0x24   : > { %1677 = dma.vmem_to_smem (!%p1675_p12), %s217_s12, 16, %s2317_s14, [#allocation4]  }
  0x2a   : > { %2166 = dma.done.wait (%p1682_p9), [#allocation4], 16  }
  0x2b   : > { %2168 = vsyncadd (%p1682_p9), [#allocation4], 4294967280 }
  0x2c   : > { %283 = sfence }
  0x2d   : > { %s2425_s15 = smul.u32 9, %s2379_s25  ;;  %s2428_s16 = sand.u32 1, %s2179_s22   ;;  %v401_v0 = vlaneseq }
  0x2e   : > { %s389_s17 = sld [smem:[#allocation2]]  ;;  %s1604_s18 = sld [smem:[#allocation2 + $0x1]] }
  0x2f   : > { %p340_p10 = scmp.lt.s32.totalorder %s2425_s15, 32  ;;  %s1666_s19 = smul.u32 9, %s2428_s16  ;;  %vm403_vm0 = vcmp.lt.s32.totalorder %v401_v0, 128  ;;  %vm2458_vm1 = vcmp.lt.s32.totalorder %v401_v0, 384  ;;  %vm441_vm2 = vcmp.lt.s32.totalorder %v401_v0, 768 }
  0x30   : > { %s1605_s28 = sld [smem:[#allocation2 + $0x2]]  ;;  %s3380_s1 = sld [smem:[#allocation11_spill]] }
  0x31   : > { %s341_s20 = scalar_select %p340_p10, %s2425_s15, 32 }
  0x32   : > { %s2438_s11 = smul.u32 27, %s2379_s25  ;;  %s3381_s2 = sld [smem:[#allocation12_spill]] }
  0x33   : > { %s2441_s12 = smul.u32 54, %s2379_s25  ;;  %s3382_s3 = sld [smem:[#allocation13_spill]] }
  0x34   : > { %v394_v1 = vstv %s389_s17  ;;  %v397_v6 = vstv %s1604_s18  ;;  %p353_p9 = scmp.lt.s32.totalorder %s2438_s11, 96  ;;  %s1667_s13 = smul.u32 27, %s2428_s16 }
  0x35   : > { %p366_p11 = scmp.lt.s32.totalorder %s2441_s12, 192  ;;  %s3385_s26 = smul.u32 54, %s2428_s16 }
  0x36   : > { %s342_s10 = scalar_lea.vmem %s3380_s1, %s341_s20  ;;  %s2448_s20 = scalar_lea.vmem [#allocation5], %s1666_s19  ;;  %v427_v9 = vstv %s1605_s28 }
  0x37   : > { %v392_v2 = vld [vmem:[%s342_s10] sm:$0xff]  ;;  %v393_v3 = vld [vmem:[%s342_s10 + $0x8] sm:$0x1]  ;;  %s354_s14 = scalar_select %p353_p9, %s2438_s11, 96 }
  0x38   : > { %v395_v4 = vmul.f32 %v394_v1, %v392_v2  ;;  %v396_v5 = vmul.f32 %v394_v1, %v393_v3  ;;  %s367_s17 = scalar_select %p366_p11, %s2441_s12, 192 }
  0x39   : > { %s355_s10 = scalar_lea.vmem %s3381_s2, %s354_s14  ;;  %s2462_s19 = scalar_lea.vmem [#allocation6], %s1667_s13  }
  0x3a   : > { %v398_v7 = vadd.f32 %v397_v6, %v395_v4  ;;  %v399_v8 = vadd.f32 %v397_v6, %v396_v5  ;;  %v406_v10 = vld [vmem:[%s355_s10] sm:$0xff]  ;;  %v407_v11 = vld [vmem:[%s355_s10 + $0x8] sm:$0xff]  ;;  %v408_v12 = vld [vmem:[%s355_s10 + $0x10] sm:$0xff]  ;;  %s368_s0 = scalar_lea.vmem %s3382_s3, %s367_s17  ;;  %s2472_s28 = scalar_lea.vmem [#allocation7], %s3385_s26  }
  0x3b   : > { %v410_v13 = vmul.f32 %v406_v10, %v394_v1  ;;  %v411_v14 = vmul.f32 %v407_v11, %v394_v1  ;;  %v412_v15 = vmul.f32 %v408_v12, %v394_v1  ;;  %v409_v16 = vld [vmem:[%s355_s10 + $0x18] sm:$0x7]  ;;  %v420_v18 = vld [vmem:[%s368_s0] sm:$0xff]  ;;  %v421_v19 = vld [vmem:[%s368_s0 + $0x8] sm:$0xff]  ;;  %s461_s13 = ssub.s32 (%p2396_p5), 33, %s2425_s15 }
  0x3c   : > { %400 = vst [vmem:[%s2448_s20] sm:$0xff] %v398_v7  ;;  %405 = vst.msk [vmem:[%s2448_s20 + $0x8] sm:$0x1] %vm403_vm0, %v399_v8  ;;  %v413_v20 = vmul.f32 %v409_v16, %v394_v1  ;;  %v428_v21 = vmul.f32 %v427_v9, %v420_v18  ;;  %v429_v22 = vmul.f32 %v427_v9, %v421_v19  ;;  %v422_v23 = vld [vmem:[%s368_s0 + $0x10] sm:$0xff]  ;;  %v423_v24 = vld [vmem:[%s368_s0 + $0x18] sm:$0xff]  ;;  %459 = sbr.rel (!%p2396_p5) target bundleno = 96 (0x60), region = 44  ;;  %p462_p12 = scmp.lt.s32.totalorder (%p2396_p5), %s461_s13, 9 }
  0x3d   : > { %v424_v25 = vld [vmem:[%s368_s0 + $0x20] sm:$0xff]  ;;  %414 = vst [vmem:[%s2462_s19] sm:$0xff] %v410_v13  ;;  %415 = vst [vmem:[%s2462_s19 + $0x8] sm:$0xff] %v411_v14  ;;  %v430_v26 = vmul.f32 %v427_v9, %v422_v23  ;;  %v431_v27 = vmul.f32 %v427_v9, %v423_v24  ;;  %v425_v29 = vld [vmem:[%s368_s0 + $0x28] sm:$0xff] }
  0x3e   : > { %416 = vst [vmem:[%s2462_s19 + $0x10] sm:$0xff] %v412_v15  ;;  %v432_v28 = vmul.f32 %v427_v9, %v424_v25  ;;  %v426_v30 = vld [vmem:[%s368_s0 + $0x30] sm:$0x3f]  ;;  %419 = vst.msk [vmem:[%s2462_s19 + $0x18] sm:$0x7] %vm2458_vm1, %v413_v20  ;;  %v433_v31 = vmul.f32 %v427_v9, %v425_v29  ;;  %s3370_s0 = scalar_lea.sflag [#allocation3], %s2428_s16 }
  0x3f   : > { %435 = vst [vmem:[%s2472_s28] sm:$0xff] %v428_v21  ;;  %436 = vst [vmem:[%s2472_s28 + $0x8] sm:$0xff] %v429_v22  ;;  %v434_v32 = vmul.f32 %v427_v9, %v426_v30 }
  0x40   : > { %437 = vst [vmem:[%s2472_s28 + $0x10] sm:$0xff] %v430_v26  ;;  %438 = vst [vmem:[%s2472_s28 + $0x18] sm:$0xff] %v431_v27 }
  0x41   : > { %439 = vst [vmem:[%s2472_s28 + $0x20] sm:$0xff] %v432_v28  ;;  %440 = vst [vmem:[%s2472_s28 + $0x28] sm:$0xff] %v433_v31 }
  0x42   : > { %443 = vst.msk [vmem:[%s2472_s28 + $0x30] sm:$0x3f] %vm441_vm2, %v434_v32 }
  0x43   : > { %s3415_s13 = smov (!%p462_p12, %s461_s13), 9 }
  0x44   : > { %s2485_s14 = sshll.u32 %s3415_s13, 4 }
  0x45   : > { %s466_s17 = ssub.s32 144, %s2485_s14 }
  0x46   : > { %467 = vsyncadd %s3370_s0, %s466_s17  ;;  %p1607_p13 = scmp.ne.s32.totalorder %s2485_s14, 0  ;;  %s1657_s29 = smul.u32 144, %s2379_s25 }
  0x47   : > { %s472_s9 = sshll.u32 %s2448_s20, 4  ;;  %s3386_s4 = sld [smem:[#allocation14_spill]]  ;;  %s473_s9 = int_to_ptr.vmem [resolvable:$true] %s472_s9 }
  0x48   : > { %s1993_s26 = scalar_lea.vmem %s473_s9, %s2485_s14  ;;  %s2318_s13 = smov [#allocation5]  }
  0x49   : > { %p1994_p0 = scmp.ne.s32.totalorder %s473_s9, %s1993_s26  ;;  %s1997_s17 = sshll.u32 %s2318_s13, 4  ;;  %s1998_s17 = int_to_ptr.vmem [resolvable:$false] %s1997_s17 }
  0x4a   : > { %s1999_s0 = scalar_lea.vmem %s1998_s17, 288  ;;  %p2000_p3 = scmp.lt.s32.totalorder %s473_s9, %s1998_s17 }
  0x4b   : > { %p1995_p1 = pnand %p1994_p0, %p1607_p13  ;;  %p2001_p4 = scmp.lt.s32.totalorder %s1999_s0, %s1993_s26 }
  0x4d   : > { %s2496_s15 = scalar_lea.hbm %s3386_s4, %s1657_s29  ;;  %p1996_p2 = pneg %p1995_p1 }
  0x4e   : > { %p2002_p7 = por %p2001_p4, %p2000_p3 }
  0x50   : > { %p2003_p8 = pnand %p2002_p7, %p1996_p2 }
  0x52   : > { %2006 = shalt.err (!%p2003_p8)
}
  0x53   : > { %s2007_s25 = scalar_lea.hbm %s2496_s15, %s2485_s14  ;;  %s2011_s10 = scalar_lea.hbm %s3386_s4, 528 }
  0x54   : > { %p2008_p10 = scmp.ne.s32.totalorder %s2496_s15, %s2007_s25  ;;  %p2012_p12 = scmp.lt.u32.totalorder %s2496_s15, %s3386_s4 }
  0x55   : > { %p2013_p0 = scmp.lt.u32.totalorder %s2011_s10, %s2007_s25  ;;  %p2015_p2 = scmp.lt.u32.totalorder %s2007_s25, %s2496_s15 }
  0x56   : > { %p2009_p9 = pnand %p2008_p10, %p1607_p13 }
  0x57   : > { %p2014_p1 = por %p2013_p0, %p2012_p12 }
  0x58   : > { %p2010_p11 = pneg %p2009_p9 }
  0x59   : > { %p2016_p3 = por %p2015_p2, %p2014_p1 }
  0x5b   : > { %p2017_p4 = pnand %p2016_p3, %p2010_p11 }
  0x5d   : > { %2020 = shalt.err (!%p2017_p4)
}
  0x5e   : > { %s3387_s26 = scalar_lea.sflag [#allocation3], %s2428_s16 }
  0x5f   : > { %475 = dma.vmem_to_hbm [thread:$0]  (%p1607_p13), %s473_s9, %s2485_s14, %s2496_s15, %s3387_s26  }
  0x60 PF: > { %478 = sbr.rel (!%p2396_p5) target bundleno = 268 (0x10c), region = 48  ;;  %s480_s13 = ssub.s32 (%p2396_p5), 97, %s2438_s11 }
  0x61   : > { %s2527_s25 = scalar_lea.vmem (%p2396_p5), %s3368_s5, %s2438_s11   ;;  %p481_p7 = scmp.lt.s32.totalorder (%p2396_p5), %s480_s13, 27 }
  0x67   : > { %s3417_s13 = smov (!%p481_p7, %s480_s13), 27 }
  0x68   : > { %s1609_s16 = sshll.u32 %s3417_s13, 4 }
  0x69   : > { %p1611_p8 = scmp.eq.s32.totalorder %s1609_s16, 0 }
  0x6a   : > { %p489_p13 = scmp.lt.u32.totalorder (!%p1611_p8), %s3417_s13, 8 }
  0x6b   : > { %488 = sbr.rel (%p1611_p8) target bundleno = 268 (0x10c), region = 52 }
  0x72   : > { %492 = sbr.rel (%p489_p13) target bundleno = 259 (0x103), region = 56  ;;  %s2534_s14 = sand.u32 (!%p489_p13), 7, %s3417_s13  }
  0x73   : > { %p508_p10 = scmp.eq.s32.totalorder (!%p489_p13), %s2534_s14, 0  ;;  %p1612_p9 = scmp.ne.s32.totalorder (!%p489_p13), %s2534_s14, 0 }
  0x79   : > { %511 = sbr.rel (%p1612_p9) target bundleno = 188 (0xbc), region = 71  ;;  %s512_s11 = sshrl.u32 (!%p1612_p9), %s3417_s13, 3 }
  0x7a   : > { %s2541_s9 = sshrl.u32 (!%p1612_p9), %s512_s11, 6 }
  0x7b   : > { %p1613_p11 = scmp.le.s32.totalorder (!%p1612_p9), %s2541_s9, 0 }
  0x80   : > { %1431 = sbr.rel (%p1613_p11) target bundleno = 168 (0xa8), region = 268  ;;  %s3388_s15 = smov (!%p1613_p11), %s2527_s25 }
  0x81   : > { %s3389_s29 = smov (!%p1613_p11), %s2462_s19  ;;  %s2550_s10 = smov (!%p1613_p11), 0  }
  0x82   : > { %s2552_s18 = smov (!%p1613_p11), 0  }
  0x87 LB: >> { %v525_v33 = vld [vmem:[%s2195_s29] sm:$0xff]  ;;  %v527_v34 = vld [vmem:[%s2195_s29 + $0x8] sm:$0xff]  ;;  %v529_v35 = vld [vmem:[%s2195_s29 + $0x10] sm:$0xff]  ;;  %s653_s0 = sadd.s32 1, %s2199_s10  ;;  %s519_s18 = sadd.s32 1, %s2203_s18   ;;  %s2203_s18 = sphi %s2552_s18, %s519_s18   ;;  %s2199_s10 = sphi %s2550_s10, %s3392_s10   ;;  %s2195_s29 = sphi %s3389_s29, %s3391_s29   ;;  %s2191_s15 = sphi %s3388_s15, %s3390_s15  }
  0x88   : >> { %526 = vst [vmem:[%s2191_s15] sm:$0xff] %v525_v33  ;;  %528 = vst [vmem:[%s2191_s15 + $0x8] sm:$0xff] %v527_v34  ;;  %v531_v36 = vld [vmem:[%s2195_s29 + $0x18] sm:$0xff]  ;;  %v533_v37 = vld [vmem:[%s2195_s29 + $0x20] sm:$0xff]  ;;  %p654_p12 = scmp.ge.s32.totalorder %s653_s0, %s2541_s9  ;;  %p518_p0 = scmp.ge.s32.totalorder %s519_s18, %s2541_s9 }
  0x89   : >> { %530 = vst [vmem:[%s2191_s15 + $0x10] sm:$0xff] %v529_v35  ;;  %v535_v38 = vld [vmem:[%s2195_s29 + $0x28] sm:$0xff]  ;;  %532 = vst [vmem:[%s2191_s15 + $0x18] sm:$0xff] %v531_v36  ;;  %v537_v39 = vld [vmem:[%s2195_s29 + $0x30] sm:$0xff] }
  0x8a   : >> { %534 = vst [vmem:[%s2191_s15 + $0x20] sm:$0xff] %v533_v37  ;;  %536 = vst [vmem:[%s2191_s15 + $0x28] sm:$0xff] %v535_v38  ;;  %v539_v40 = vld [vmem:[%s2195_s29 + $0x38] sm:$0xff]  ;;  %v541_v41 = vld [vmem:[%s2195_s29 + $0x40] sm:$0xff]  ;;  %s3419_s0 = smov (%p654_p12, %s653_s0), 0 }
  0x8b   : >> { %538 = vst [vmem:[%s2191_s15 + $0x30] sm:$0xff] %v537_v39  ;;  %540 = vst [vmem:[%s2191_s15 + $0x38] sm:$0xff] %v539_v40  ;;  %v543_v42 = vld [vmem:[%s2195_s29 + $0x48] sm:$0xff]  ;;  %v545_v43 = vld [vmem:[%s2195_s29 + $0x50] sm:$0xff]  ;;  %s1614_s26 = sshll.u32 %s3419_s0, 9  ;;  %s3392_s10 = smov %s3419_s0 }
  0x8c   : >> { %542 = vst [vmem:[%s2191_s15 + $0x40] sm:$0xff] %v541_v41  ;;  %v547_v44 = vld [vmem:[%s2195_s29 + $0x58] sm:$0xff]  ;;  %544 = vst [vmem:[%s2191_s15 + $0x48] sm:$0xff] %v543_v42  ;;  %v549_v45 = vld [vmem:[%s2195_s29 + $0x60] sm:$0xff]  ;;  %s2608_s17 = scalar_lea.vmem %s2462_s19, %s1614_s26 [#allocation6]   ;;  %s2611_s20 = scalar_lea.vmem %s2527_s25, %s1614_s26  }
  0x8d   : >> { %546 = vst [vmem:[%s2191_s15 + $0x50] sm:$0xff] %v545_v43  ;;  %548 = vst [vmem:[%s2191_s15 + $0x58] sm:$0xff] %v547_v44  ;;  %v551_v46 = vld [vmem:[%s2195_s29 + $0x68] sm:$0xff]  ;;  %v553_v47 = vld [vmem:[%s2195_s29 + $0x70] sm:$0xff] }
  0x8e   : >> { %550 = vst [vmem:[%s2191_s15 + $0x60] sm:$0xff] %v549_v45  ;;  %552 = vst [vmem:[%s2191_s15 + $0x68] sm:$0xff] %v551_v46  ;;  %v555_v48 = vld [vmem:[%s2195_s29 + $0x78] sm:$0xff]  ;;  %v557_v49 = vld [vmem:[%s2195_s29 + $0x80] sm:$0xff] }
  0x8f   : >> { %554 = vst [vmem:[%s2191_s15 + $0x70] sm:$0xff] %v553_v47  ;;  %v559_v50 = vld [vmem:[%s2195_s29 + $0x88] sm:$0xff]  ;;  %556 = vst [vmem:[%s2191_s15 + $0x78] sm:$0xff] %v555_v48  ;;  %v561_v51 = vld [vmem:[%s2195_s29 + $0x90] sm:$0xff] }
  0x90   : >> { %558 = vst [vmem:[%s2191_s15 + $0x80] sm:$0xff] %v557_v49  ;;  %560 = vst [vmem:[%s2191_s15 + $0x88] sm:$0xff] %v559_v50  ;;  %v563_v52 = vld [vmem:[%s2195_s29 + $0x98] sm:$0xff]  ;;  %v565_v53 = vld [vmem:[%s2195_s29 + $0xa0] sm:$0xff] }
  0x91   : >> { %562 = vst [vmem:[%s2191_s15 + $0x90] sm:$0xff] %v561_v51  ;;  %564 = vst [vmem:[%s2191_s15 + $0x98] sm:$0xff] %v563_v52  ;;  %v567_v54 = vld [vmem:[%s2195_s29 + $0xa8] sm:$0xff]  ;;  %v569_v55 = vld [vmem:[%s2195_s29 + $0xb0] sm:$0xff] }
  0x92   : >> { %566 = vst [vmem:[%s2191_s15 + $0xa0] sm:$0xff] %v565_v53  ;;  %v571_v56 = vld [vmem:[%s2195_s29 + $0xb8] sm:$0xff]  ;;  %568 = vst [vmem:[%s2191_s15 + $0xa8] sm:$0xff] %v567_v54  ;;  %v573_v57 = vld [vmem:[%s2195_s29 + $0xc0] sm:$0xff] }
  0x93   : >> { %570 = vst [vmem:[%s2191_s15 + $0xb0] sm:$0xff] %v569_v55  ;;  %572 = vst [vmem:[%s2191_s15 + $0xb8] sm:$0xff] %v571_v56  ;;  %v575_v58 = vld [vmem:[%s2195_s29 + $0xc8] sm:$0xff]  ;;  %v577_v59 = vld [vmem:[%s2195_s29 + $0xd0] sm:$0xff] }
  0x94   : >> { %574 = vst [vmem:[%s2191_s15 + $0xc0] sm:$0xff] %v573_v57  ;;  %576 = vst [vmem:[%s2191_s15 + $0xc8] sm:$0xff] %v575_v58  ;;  %v579_v60 = vld [vmem:[%s2195_s29 + $0xd8] sm:$0xff]  ;;  %v581_v61 = vld [vmem:[%s2195_s29 + $0xe0] sm:$0xff] }
  0x95   : >> { %578 = vst [vmem:[%s2191_s15 + $0xd0] sm:$0xff] %v577_v59  ;;  %v583_v62 = vld [vmem:[%s2195_s29 + $0xe8] sm:$0xff]  ;;  %580 = vst [vmem:[%s2191_s15 + $0xd8] sm:$0xff] %v579_v60  ;;  %v585_v63 = vld [vmem:[%s2195_s29 + $0xf0] sm:$0xff] }
  0x96   : >> { %582 = vst [vmem:[%s2191_s15 + $0xe0] sm:$0xff] %v581_v61  ;;  %584 = vst [vmem:[%s2191_s15 + $0xe8] sm:$0xff] %v583_v62  ;;  %v587_v0 = vld [vmem:[%s2195_s29 + $0xf8] sm:$0xff]  ;;  %v589_v1 = vld [vmem:[%s2195_s29 + $0x100] sm:$0xff] }
  0x97   : >> { %586 = vst [vmem:[%s2191_s15 + $0xf0] sm:$0xff] %v585_v63  ;;  %588 = vst [vmem:[%s2191_s15 + $0xf8] sm:$0xff] %v587_v0  ;;  %v591_v2 = vld [vmem:[%s2195_s29 + $0x108] sm:$0xff]  ;;  %v593_v3 = vld [vmem:[%s2195_s29 + $0x110] sm:$0xff] }
  0x98   : >> { %590 = vst [vmem:[%s2191_s15 + $0x100] sm:$0xff] %v589_v1  ;;  %v595_v4 = vld [vmem:[%s2195_s29 + $0x118] sm:$0xff]  ;;  %592 = vst [vmem:[%s2191_s15 + $0x108] sm:$0xff] %v591_v2  ;;  %v597_v5 = vld [vmem:[%s2195_s29 + $0x120] sm:$0xff] }
  0x99   : >> { %594 = vst [vmem:[%s2191_s15 + $0x110] sm:$0xff] %v593_v3  ;;  %596 = vst [vmem:[%s2191_s15 + $0x118] sm:$0xff] %v595_v4  ;;  %v599_v6 = vld [vmem:[%s2195_s29 + $0x128] sm:$0xff]  ;;  %v601_v7 = vld [vmem:[%s2195_s29 + $0x130] sm:$0xff] }
  0x9a   : >> { %598 = vst [vmem:[%s2191_s15 + $0x120] sm:$0xff] %v597_v5  ;;  %600 = vst [vmem:[%s2191_s15 + $0x128] sm:$0xff] %v599_v6  ;;  %v603_v8 = vld [vmem:[%s2195_s29 + $0x138] sm:$0xff]  ;;  %v605_v9 = vld [vmem:[%s2195_s29 + $0x140] sm:$0xff] }
  0x9b   : >> { %602 = vst [vmem:[%s2191_s15 + $0x130] sm:$0xff] %v601_v7  ;;  %v607_v10 = vld [vmem:[%s2195_s29 + $0x148] sm:$0xff]  ;;  %604 = vst [vmem:[%s2191_s15 + $0x138] sm:$0xff] %v603_v8  ;;  %v609_v11 = vld [vmem:[%s2195_s29 + $0x150] sm:$0xff] }
  0x9c   : >> { %606 = vst [vmem:[%s2191_s15 + $0x140] sm:$0xff] %v605_v9  ;;  %608 = vst [vmem:[%s2191_s15 + $0x148] sm:$0xff] %v607_v10  ;;  %v611_v12 = vld [vmem:[%s2195_s29 + $0x158] sm:$0xff]  ;;  %v613_v13 = vld [vmem:[%s2195_s29 + $0x160] sm:$0xff] }
  0x9d   : >> { %610 = vst [vmem:[%s2191_s15 + $0x150] sm:$0xff] %v609_v11  ;;  %612 = vst [vmem:[%s2191_s15 + $0x158] sm:$0xff] %v611_v12  ;;  %v615_v14 = vld [vmem:[%s2195_s29 + $0x168] sm:$0xff]  ;;  %v617_v15 = vld [vmem:[%s2195_s29 + $0x170] sm:$0xff] }
  0x9e   : >> { %614 = vst [vmem:[%s2191_s15 + $0x160] sm:$0xff] %v613_v13  ;;  %v619_v16 = vld [vmem:[%s2195_s29 + $0x178] sm:$0xff]  ;;  %616 = vst [vmem:[%s2191_s15 + $0x168] sm:$0xff] %v615_v14  ;;  %v621_v17 = vld [vmem:[%s2195_s29 + $0x180] sm:$0xff] }
  0x9f   : >> { %618 = vst [vmem:[%s2191_s15 + $0x170] sm:$0xff] %v617_v15  ;;  %620 = vst [vmem:[%s2191_s15 + $0x178] sm:$0xff] %v619_v16  ;;  %v623_v18 = vld [vmem:[%s2195_s29 + $0x188] sm:$0xff]  ;;  %v625_v19 = vld [vmem:[%s2195_s29 + $0x190] sm:$0xff] }
  0xa0   : >> { %622 = vst [vmem:[%s2191_s15 + $0x180] sm:$0xff] %v621_v17  ;;  %624 = vst [vmem:[%s2191_s15 + $0x188] sm:$0xff] %v623_v18  ;;  %v627_v20 = vld [vmem:[%s2195_s29 + $0x198] sm:$0xff]  ;;  %v629_v21 = vld [vmem:[%s2195_s29 + $0x1a0] sm:$0xff] }
  0xa1   : >> { %626 = vst [vmem:[%s2191_s15 + $0x190] sm:$0xff] %v625_v19  ;;  %v631_v22 = vld [vmem:[%s2195_s29 + $0x1a8] sm:$0xff]  ;;  %628 = vst [vmem:[%s2191_s15 + $0x198] sm:$0xff] %v627_v20  ;;  %v633_v23 = vld [vmem:[%s2195_s29 + $0x1b0] sm:$0xff]  ;;  %521 = sbr.rel (!%p518_p0) target bundleno = 135 (0x87), region = 274 }
  0xa2   : >> { %630 = vst [vmem:[%s2191_s15 + $0x1a0] sm:$0xff] %v629_v21  ;;  %632 = vst [vmem:[%s2191_s15 + $0x1a8] sm:$0xff] %v631_v22  ;;  %v635_v24 = vld [vmem:[%s2195_s29 + $0x1b8] sm:$0xff]  ;;  %v637_v25 = vld [vmem:[%s2195_s29 + $0x1c0] sm:$0xff] }
  0xa3   : >> { %634 = vst [vmem:[%s2191_s15 + $0x1b0] sm:$0xff] %v633_v23  ;;  %636 = vst [vmem:[%s2191_s15 + $0x1b8] sm:$0xff] %v635_v24  ;;  %v639_v26 = vld [vmem:[%s2195_s29 + $0x1c8] sm:$0xff]  ;;  %v641_v27 = vld [vmem:[%s2195_s29 + $0x1d0] sm:$0xff] }
  0xa4   : >> { %638 = vst [vmem:[%s2191_s15 + $0x1c0] sm:$0xff] %v637_v25  ;;  %v643_v28 = vld [vmem:[%s2195_s29 + $0x1d8] sm:$0xff]  ;;  %640 = vst [vmem:[%s2191_s15 + $0x1c8] sm:$0xff] %v639_v26  ;;  %v645_v29 = vld [vmem:[%s2195_s29 + $0x1e0] sm:$0xff] }
  0xa5   : >> { %642 = vst [vmem:[%s2191_s15 + $0x1d0] sm:$0xff] %v641_v27  ;;  %644 = vst [vmem:[%s2191_s15 + $0x1d8] sm:$0xff] %v643_v28  ;;  %v647_v30 = vld [vmem:[%s2195_s29 + $0x1e8] sm:$0xff]  ;;  %v649_v31 = vld [vmem:[%s2195_s29 + $0x1f0] sm:$0xff] }
  0xa6   : >> { %646 = vst [vmem:[%s2191_s15 + $0x1e0] sm:$0xff] %v645_v29  ;;  %648 = vst [vmem:[%s2191_s15 + $0x1e8] sm:$0xff] %v647_v30  ;;  %v651_v32 = vld [vmem:[%s2195_s29 + $0x1f8] sm:$0xff]  ;;  %s3391_s29 = smov %s2608_s17 }
  0xa7   : >> { %650 = vst [vmem:[%s2191_s15 + $0x1f0] sm:$0xff] %v649_v31  ;;  %652 = vst [vmem:[%s2191_s15 + $0x1f8] sm:$0xff] %v651_v32  ;;  %s3390_s15 = smov %s2611_s20 }
  0xa8 PF: > { %s2717_s16 = sand.u32 63, %s512_s11   ;;  %s1658_s26 = sshll.u32 %s2541_s9, 13 }
  0xa9   : > { %s664_s1 = sshra.s32 %s1658_s26, 4  ;;  %p1619_p1 = scmp.le.s32.totalorder %s2717_s16, 0 }
  0xaa   : > { %s665_s2 = scalar_lea.vmem %s2462_s19, %s664_s1 [#allocation6]   ;;  %s668_s3 = scalar_lea.vmem %s2527_s25, %s664_s1  }
  0xab   : > { %1445 = sbr.rel (%p1619_p1) target bundleno = 188 (0xbc), region = 279  ;;  %s2205_s17 = smov (!%p1619_p1), %s668_s3  }
  0xac   : > { %s2209_s0 = smov (!%p1619_p1), %s665_s2   ;;  %s2213_s20 = smov (!%p1619_p1), 0  }
  0xad   : > { %s2217_s18 = smov (!%p1619_p1), 0  }
  0xb2 LB: >> { %v680_v33 = vld [vmem:[%s2211_s0] sm:$0xff]  ;;  %s682_s11 = sadd.s32 1, %s2215_s20  ;;  %s674_s18 = sadd.s32 1, %s2219_s18   ;;  %s2219_s18 = sphi %s2217_s18, %s674_s18   ;;  %s2215_s20 = sphi %s2213_s20, %s2214_s20   ;;  %s2211_s0 = sphi %s2209_s0, %s687_s0   ;;  %s2207_s17 = sphi %s2205_s17, %s688_s17  }
  0xb3   : >> { %681 = vst [vmem:[%s2207_s17] sm:$0xff] %v680_v33  ;;  %p683_p2 = scmp.ge.s32.totalorder %s682_s11, %s2717_s16  ;;  %p673_p3 = scmp.ge.s32.totalorder %s674_s18, %s2717_s16 }
  0xb5   : >> { %s3421_s11 = smov (%p683_p2, %s682_s11), 0  ;;  %676 = sbr.rel (!%p673_p3) target bundleno = 178 (0xb2), region = 285 }
  0xb6   : >> { %s1620_s1 = sshll.u32 %s3421_s11, 3  ;;  %s2214_s20 = smov %s3421_s11  }
  0xb7   : >> { %s687_s0 = scalar_lea.vmem %s665_s2, %s1620_s1 [#allocation6]   ;;  %s688_s17 = scalar_lea.vmem %s668_s3, %s1620_s1  }
  0xbc PF: > { %691 = sbr.rel (%p508_p10) target bundleno = 259 (0x103), region = 89  ;;  %s2729_s9 = ssub.s32 (!%p508_p10), %s3417_s13, %s2534_s14 }
  0xbd   : > { %s697_s15 = sshrl.u32 (!%p508_p10), %s3417_s13, 3 }
  0xbe   : > { %s2738_s26 = sshrl.u32 (!%p508_p10), %s697_s15, 6 }
  0xbf   : > { %p1622_p4 = scmp.le.s32.totalorder (!%p508_p10), %s2738_s26, 0 }
  0xc3   : > { %1459 = sbr.rel (%p1622_p4) target bundleno = 235 (0xeb), region = 290  ;;  %s3393_s2 = smov (!%p1622_p4), %s2527_s25 }
  0xc4   : > { %s3394_s3 = smov (!%p1622_p4), %s2462_s19  ;;  %s2747_s16 = smov (!%p1622_p4), 0  }
  0xc5   : > { %s2749_s17 = smov (!%p1622_p4), 0  }
  0xca LB: >> { %v710_v34 = vld [vmem:[%s2227_s3] sm:$0xff]  ;;  %v712_v35 = vld [vmem:[%s2227_s3 + $0x8] sm:$0xff]  ;;  %v714_v36 = vld [vmem:[%s2227_s3 + $0x10] sm:$0xff]  ;;  %s838_s0 = sadd.s32 1, %s2231_s16  ;;  %s704_s17 = sadd.s32 1, %s2235_s17   ;;  %s2235_s17 = sphi %s2749_s17, %s704_s17   ;;  %s2231_s16 = sphi %s2747_s16, %s3397_s16   ;;  %s2227_s3 = sphi %s3394_s3, %s3396_s3   ;;  %s2223_s2 = sphi %s3393_s2, %s3395_s2  }
  0xcb   : >> { %711 = vst [vmem:[%s2223_s2] sm:$0xff] %v710_v34  ;;  %713 = vst [vmem:[%s2223_s2 + $0x8] sm:$0xff] %v712_v35  ;;  %v716_v37 = vld [vmem:[%s2227_s3 + $0x18] sm:$0xff]  ;;  %v718_v38 = vld [vmem:[%s2227_s3 + $0x20] sm:$0xff]  ;;  %p839_p7 = scmp.ge.s32.totalorder %s838_s0, %s2738_s26  ;;  %p703_p8 = scmp.ge.s32.totalorder %s704_s17, %s2738_s26 }
  0xcc   : >> { %715 = vst [vmem:[%s2223_s2 + $0x10] sm:$0xff] %v714_v36  ;;  %v720_v39 = vld [vmem:[%s2227_s3 + $0x28] sm:$0xff]  ;;  %717 = vst [vmem:[%s2223_s2 + $0x18] sm:$0xff] %v716_v37  ;;  %v722_v40 = vld [vmem:[%s2227_s3 + $0x30] sm:$0xff] }
  0xcd   : >> { %719 = vst [vmem:[%s2223_s2 + $0x20] sm:$0xff] %v718_v38  ;;  %721 = vst [vmem:[%s2223_s2 + $0x28] sm:$0xff] %v720_v39  ;;  %v724_v41 = vld [vmem:[%s2227_s3 + $0x38] sm:$0xff]  ;;  %v726_v42 = vld [vmem:[%s2227_s3 + $0x40] sm:$0xff]  ;;  %s3423_s0 = smov (%p839_p7, %s838_s0), 0 }
  0xce   : >> { %723 = vst [vmem:[%s2223_s2 + $0x30] sm:$0xff] %v722_v40  ;;  %725 = vst [vmem:[%s2223_s2 + $0x38] sm:$0xff] %v724_v41  ;;  %v728_v43 = vld [vmem:[%s2227_s3 + $0x48] sm:$0xff]  ;;  %v730_v44 = vld [vmem:[%s2227_s3 + $0x50] sm:$0xff]  ;;  %s1623_s20 = sshll.u32 %s3423_s0, 9  ;;  %s3397_s16 = smov %s3423_s0 }
  0xcf   : >> { %727 = vst [vmem:[%s2223_s2 + $0x40] sm:$0xff] %v726_v42  ;;  %v732_v45 = vld [vmem:[%s2227_s3 + $0x58] sm:$0xff]  ;;  %729 = vst [vmem:[%s2223_s2 + $0x48] sm:$0xff] %v728_v43  ;;  %v734_v46 = vld [vmem:[%s2227_s3 + $0x60] sm:$0xff]  ;;  %s2805_s18 = scalar_lea.vmem %s2462_s19, %s1623_s20 [#allocation6]   ;;  %s2808_s11 = scalar_lea.vmem %s2527_s25, %s1623_s20  }
  0xd0   : >> { %731 = vst [vmem:[%s2223_s2 + $0x50] sm:$0xff] %v730_v44  ;;  %733 = vst [vmem:[%s2223_s2 + $0x58] sm:$0xff] %v732_v45  ;;  %v736_v47 = vld [vmem:[%s2227_s3 + $0x68] sm:$0xff]  ;;  %v738_v48 = vld [vmem:[%s2227_s3 + $0x70] sm:$0xff] }
  0xd1   : >> { %735 = vst [vmem:[%s2223_s2 + $0x60] sm:$0xff] %v734_v46  ;;  %737 = vst [vmem:[%s2223_s2 + $0x68] sm:$0xff] %v736_v47  ;;  %v740_v49 = vld [vmem:[%s2227_s3 + $0x78] sm:$0xff]  ;;  %v742_v50 = vld [vmem:[%s2227_s3 + $0x80] sm:$0xff] }
  0xd2   : >> { %739 = vst [vmem:[%s2223_s2 + $0x70] sm:$0xff] %v738_v48  ;;  %v744_v51 = vld [vmem:[%s2227_s3 + $0x88] sm:$0xff]  ;;  %741 = vst [vmem:[%s2223_s2 + $0x78] sm:$0xff] %v740_v49  ;;  %v746_v52 = vld [vmem:[%s2227_s3 + $0x90] sm:$0xff] }
  0xd3   : >> { %743 = vst [vmem:[%s2223_s2 + $0x80] sm:$0xff] %v742_v50  ;;  %745 = vst [vmem:[%s2223_s2 + $0x88] sm:$0xff] %v744_v51  ;;  %v748_v53 = vld [vmem:[%s2227_s3 + $0x98] sm:$0xff]  ;;  %v750_v54 = vld [vmem:[%s2227_s3 + $0xa0] sm:$0xff] }
  0xd4   : >> { %747 = vst [vmem:[%s2223_s2 + $0x90] sm:$0xff] %v746_v52  ;;  %749 = vst [vmem:[%s2223_s2 + $0x98] sm:$0xff] %v748_v53  ;;  %v752_v55 = vld [vmem:[%s2227_s3 + $0xa8] sm:$0xff]  ;;  %v754_v56 = vld [vmem:[%s2227_s3 + $0xb0] sm:$0xff] }
  0xd5   : >> { %751 = vst [vmem:[%s2223_s2 + $0xa0] sm:$0xff] %v750_v54  ;;  %v756_v57 = vld [vmem:[%s2227_s3 + $0xb8] sm:$0xff]  ;;  %753 = vst [vmem:[%s2223_s2 + $0xa8] sm:$0xff] %v752_v55  ;;  %v758_v58 = vld [vmem:[%s2227_s3 + $0xc0] sm:$0xff] }
  0xd6   : >> { %755 = vst [vmem:[%s2223_s2 + $0xb0] sm:$0xff] %v754_v56  ;;  %757 = vst [vmem:[%s2223_s2 + $0xb8] sm:$0xff] %v756_v57  ;;  %v760_v59 = vld [vmem:[%s2227_s3 + $0xc8] sm:$0xff]  ;;  %v762_v60 = vld [vmem:[%s2227_s3 + $0xd0] sm:$0xff] }
  0xd7   : >> { %759 = vst [vmem:[%s2223_s2 + $0xc0] sm:$0xff] %v758_v58  ;;  %761 = vst [vmem:[%s2223_s2 + $0xc8] sm:$0xff] %v760_v59  ;;  %v764_v61 = vld [vmem:[%s2227_s3 + $0xd8] sm:$0xff]  ;;  %v766_v62 = vld [vmem:[%s2227_s3 + $0xe0] sm:$0xff] }
  0xd8   : >> { %763 = vst [vmem:[%s2223_s2 + $0xd0] sm:$0xff] %v762_v60  ;;  %v768_v63 = vld [vmem:[%s2227_s3 + $0xe8] sm:$0xff]  ;;  %765 = vst [vmem:[%s2223_s2 + $0xd8] sm:$0xff] %v764_v61  ;;  %v770_v0 = vld [vmem:[%s2227_s3 + $0xf0] sm:$0xff] }
  0xd9   : >> { %767 = vst [vmem:[%s2223_s2 + $0xe0] sm:$0xff] %v766_v62  ;;  %769 = vst [vmem:[%s2223_s2 + $0xe8] sm:$0xff] %v768_v63  ;;  %v772_v1 = vld [vmem:[%s2227_s3 + $0xf8] sm:$0xff]  ;;  %v774_v2 = vld [vmem:[%s2227_s3 + $0x100] sm:$0xff] }
  0xda   : >> { %771 = vst [vmem:[%s2223_s2 + $0xf0] sm:$0xff] %v770_v0  ;;  %773 = vst [vmem:[%s2223_s2 + $0xf8] sm:$0xff] %v772_v1  ;;  %v776_v3 = vld [vmem:[%s2227_s3 + $0x108] sm:$0xff]  ;;  %v778_v4 = vld [vmem:[%s2227_s3 + $0x110] sm:$0xff] }
  0xdb   : >> { %775 = vst [vmem:[%s2223_s2 + $0x100] sm:$0xff] %v774_v2  ;;  %v780_v5 = vld [vmem:[%s2227_s3 + $0x118] sm:$0xff]  ;;  %777 = vst [vmem:[%s2223_s2 + $0x108] sm:$0xff] %v776_v3  ;;  %v782_v6 = vld [vmem:[%s2227_s3 + $0x120] sm:$0xff] }
  0xdc   : >> { %779 = vst [vmem:[%s2223_s2 + $0x110] sm:$0xff] %v778_v4  ;;  %781 = vst [vmem:[%s2223_s2 + $0x118] sm:$0xff] %v780_v5  ;;  %v784_v7 = vld [vmem:[%s2227_s3 + $0x128] sm:$0xff]  ;;  %v786_v8 = vld [vmem:[%s2227_s3 + $0x130] sm:$0xff] }
  0xdd   : >> { %783 = vst [vmem:[%s2223_s2 + $0x120] sm:$0xff] %v782_v6  ;;  %785 = vst [vmem:[%s2223_s2 + $0x128] sm:$0xff] %v784_v7  ;;  %v788_v9 = vld [vmem:[%s2227_s3 + $0x138] sm:$0xff]  ;;  %v790_v10 = vld [vmem:[%s2227_s3 + $0x140] sm:$0xff] }
  0xde   : >> { %787 = vst [vmem:[%s2223_s2 + $0x130] sm:$0xff] %v786_v8  ;;  %v792_v11 = vld [vmem:[%s2227_s3 + $0x148] sm:$0xff]  ;;  %789 = vst [vmem:[%s2223_s2 + $0x138] sm:$0xff] %v788_v9  ;;  %v794_v12 = vld [vmem:[%s2227_s3 + $0x150] sm:$0xff] }
  0xdf   : >> { %791 = vst [vmem:[%s2223_s2 + $0x140] sm:$0xff] %v790_v10  ;;  %793 = vst [vmem:[%s2223_s2 + $0x148] sm:$0xff] %v792_v11  ;;  %v796_v13 = vld [vmem:[%s2227_s3 + $0x158] sm:$0xff]  ;;  %v798_v14 = vld [vmem:[%s2227_s3 + $0x160] sm:$0xff] }
  0xe0   : >> { %795 = vst [vmem:[%s2223_s2 + $0x150] sm:$0xff] %v794_v12  ;;  %797 = vst [vmem:[%s2223_s2 + $0x158] sm:$0xff] %v796_v13  ;;  %v800_v15 = vld [vmem:[%s2227_s3 + $0x168] sm:$0xff]  ;;  %v802_v16 = vld [vmem:[%s2227_s3 + $0x170] sm:$0xff] }
  0xe1   : >> { %799 = vst [vmem:[%s2223_s2 + $0x160] sm:$0xff] %v798_v14  ;;  %v804_v17 = vld [vmem:[%s2227_s3 + $0x178] sm:$0xff]  ;;  %801 = vst [vmem:[%s2223_s2 + $0x168] sm:$0xff] %v800_v15  ;;  %v806_v18 = vld [vmem:[%s2227_s3 + $0x180] sm:$0xff] }
  0xe2   : >> { %803 = vst [vmem:[%s2223_s2 + $0x170] sm:$0xff] %v802_v16  ;;  %805 = vst [vmem:[%s2223_s2 + $0x178] sm:$0xff] %v804_v17  ;;  %v808_v19 = vld [vmem:[%s2227_s3 + $0x188] sm:$0xff]  ;;  %v810_v20 = vld [vmem:[%s2227_s3 + $0x190] sm:$0xff] }
  0xe3   : >> { %807 = vst [vmem:[%s2223_s2 + $0x180] sm:$0xff] %v806_v18  ;;  %809 = vst [vmem:[%s2223_s2 + $0x188] sm:$0xff] %v808_v19  ;;  %v812_v21 = vld [vmem:[%s2227_s3 + $0x198] sm:$0xff]  ;;  %v814_v22 = vld [vmem:[%s2227_s3 + $0x1a0] sm:$0xff] }
  0xe4   : >> { %811 = vst [vmem:[%s2223_s2 + $0x190] sm:$0xff] %v810_v20  ;;  %v816_v23 = vld [vmem:[%s2227_s3 + $0x1a8] sm:$0xff]  ;;  %813 = vst [vmem:[%s2223_s2 + $0x198] sm:$0xff] %v812_v21  ;;  %v818_v24 = vld [vmem:[%s2227_s3 + $0x1b0] sm:$0xff]  ;;  %706 = sbr.rel (!%p703_p8) target bundleno = 202 (0xca), region = 296 }
  0xe5   : >> { %815 = vst [vmem:[%s2223_s2 + $0x1a0] sm:$0xff] %v814_v22  ;;  %817 = vst [vmem:[%s2223_s2 + $0x1a8] sm:$0xff] %v816_v23  ;;  %v820_v25 = vld [vmem:[%s2227_s3 + $0x1b8] sm:$0xff]  ;;  %v822_v26 = vld [vmem:[%s2227_s3 + $0x1c0] sm:$0xff] }
  0xe6   : >> { %819 = vst [vmem:[%s2223_s2 + $0x1b0] sm:$0xff] %v818_v24  ;;  %821 = vst [vmem:[%s2223_s2 + $0x1b8] sm:$0xff] %v820_v25  ;;  %v824_v27 = vld [vmem:[%s2227_s3 + $0x1c8] sm:$0xff]  ;;  %v826_v28 = vld [vmem:[%s2227_s3 + $0x1d0] sm:$0xff] }
  0xe7   : >> { %823 = vst [vmem:[%s2223_s2 + $0x1c0] sm:$0xff] %v822_v26  ;;  %v828_v29 = vld [vmem:[%s2227_s3 + $0x1d8] sm:$0xff]  ;;  %825 = vst [vmem:[%s2223_s2 + $0x1c8] sm:$0xff] %v824_v27  ;;  %v830_v30 = vld [vmem:[%s2227_s3 + $0x1e0] sm:$0xff] }
  0xe8   : >> { %827 = vst [vmem:[%s2223_s2 + $0x1d0] sm:$0xff] %v826_v28  ;;  %829 = vst [vmem:[%s2223_s2 + $0x1d8] sm:$0xff] %v828_v29  ;;  %v832_v31 = vld [vmem:[%s2227_s3 + $0x1e8] sm:$0xff]  ;;  %v834_v32 = vld [vmem:[%s2227_s3 + $0x1f0] sm:$0xff] }
  0xe9   : >> { %831 = vst [vmem:[%s2223_s2 + $0x1e0] sm:$0xff] %v830_v30  ;;  %833 = vst [vmem:[%s2223_s2 + $0x1e8] sm:$0xff] %v832_v31  ;;  %v836_v33 = vld [vmem:[%s2227_s3 + $0x1f8] sm:$0xff]  ;;  %s3396_s3 = smov %s2805_s18 }
  0xea   : >> { %835 = vst [vmem:[%s2223_s2 + $0x1f0] sm:$0xff] %v834_v32  ;;  %837 = vst [vmem:[%s2223_s2 + $0x1f8] sm:$0xff] %v836_v33  ;;  %s3395_s2 = smov %s2808_s11 }
  0xeb PF: > { %s2914_s1 = sand.u32 63, %s697_s15   ;;  %s1660_s20 = sshll.u32 %s2738_s26, 13 }
  0xec   : > { %s849_s10 = sshra.s32 %s1660_s20, 4  ;;  %p1628_p13 = scmp.le.s32.totalorder %s2914_s1, 0 }
  0xed   : > { %s850_s29 = scalar_lea.vmem %s2462_s19, %s849_s10 [#allocation6]   ;;  %s853_s4 = scalar_lea.vmem %s2527_s25, %s849_s10  }
  0xee   : > { %1473 = sbr.rel (%p1628_p13) target bundleno = 255 (0xff), region = 301  ;;  %s2237_s18 = smov (!%p1628_p13), %s853_s4  }
  0xef   : > { %s2241_s0 = smov (!%p1628_p13), %s850_s29   ;;  %s2245_s11 = smov (!%p1628_p13), 0  }
  0xf0   : > { %s2249_s17 = smov (!%p1628_p13), 0  }
  0xf5 LB: >> { %v865_v34 = vld [vmem:[%s2243_s0] sm:$0xff]  ;;  %s867_s15 = sadd.s32 1, %s2247_s11  ;;  %s859_s17 = sadd.s32 1, %s2251_s17   ;;  %s2251_s17 = sphi %s2249_s17, %s859_s17   ;;  %s2247_s11 = sphi %s2245_s11, %s2246_s11   ;;  %s2243_s0 = sphi %s2241_s0, %s872_s0   ;;  %s2239_s18 = sphi %s2237_s18, %s873_s18  }
  0xf6   : >> { %866 = vst [vmem:[%s2239_s18] sm:$0xff] %v865_v34  ;;  %p868_p10 = scmp.ge.s32.totalorder %s867_s15, %s2914_s1  ;;  %p858_p9 = scmp.ge.s32.totalorder %s859_s17, %s2914_s1 }
  0xf8   : >> { %s3425_s15 = smov (%p868_p10, %s867_s15), 0  ;;  %861 = sbr.rel (!%p858_p9) target bundleno = 245 (0xf5), region = 307 }
  0xf9   : >> { %s1629_s10 = sshll.u32 %s3425_s15, 3  ;;  %s2246_s11 = smov %s3425_s15  }
  0xfa   : >> { %s872_s0 = scalar_lea.vmem %s850_s29, %s1629_s10 [#allocation6]   ;;  %s873_s18 = scalar_lea.vmem %s853_s4, %s1629_s10  }
  0xff PF: > { %s2319_s26 = smov 0   ;;  %s3398_s3 = scalar_lea.vmem %s2462_s19, %s2729_s9 [#allocation6] }
 0x100   : > { %s874_s2 = sshllo.u32 %s2319_s26, %s2534_s14  ;;  %s3399_s16 = scalar_lea.vmem %s2527_s25, %s2729_s9 }
 0x101   : > { %v883_v35 = vld [vmem:[%s3398_s3] sm:%s874_s2] }
 0x102   : > { %884 = vst [vmem:[%s3399_s16] sm:%s874_s2] %v883_v35 }
 0x103 PF: > { %p1631_p11 = scmp.ge.u32.totalorder %s3417_s13, 8 }
 0x104   : > { %s2320_s20 = smov (!%p1631_p11), 0  }
 0x105   : > { %495 = sbr.rel (%p1631_p11) target bundleno = 268 (0x10c), region = 60  ;;  %s496_s4 = sshllo.u32 (!%p1631_p11), %s2320_s20, %s3417_s13 }
 0x106   : > { %v505_v36 = vld [vmem:[%s2462_s19] sm:%s496_s4] (!%p1631_p11) }
 0x107   : > { %506 = vst [vmem:[%s2527_s25] sm:%s496_s4] (!%p1631_p11), %v505_v36 }
 0x10c PF: > { %888 = sbr.rel (!%p2396_p5) target bundleno = 440 (0x1b8), region = 114  ;;  %s890_s14 = ssub.s32 (%p2396_p5), 193, %s2441_s12 }
 0x10d   : > { %s2940_s1 = scalar_lea.vmem (%p2396_p5), %s3369_s6, %s2441_s12   ;;  %p891_p12 = scmp.lt.s32.totalorder (%p2396_p5), %s890_s14, 54 }
 0x113   : > { %s3427_s14 = smov (!%p891_p12, %s890_s14), 54 }
 0x114   : > { %s1632_s19 = sshll.u32 %s3427_s14, 4 }
 0x115   : > { %p1634_p0 = scmp.eq.s32.totalorder %s1632_s19, 0 }
 0x116   : > { %p899_p1 = scmp.lt.u32.totalorder (!%p1634_p0), %s3427_s14, 8 }
 0x117   : > { %898 = sbr.rel (%p1634_p0) target bundleno = 440 (0x1b8), region = 118 }
 0x11e   : > { %902 = sbr.rel (%p899_p1) target bundleno = 431 (0x1af), region = 122  ;;  %s2947_s7 = sand.u32 (!%p899_p1), 7, %s3427_s14  }
 0x11f   : > { %p918_p5 = scmp.eq.s32.totalorder (!%p899_p1), %s2947_s7, 0  ;;  %p1635_p2 = scmp.ne.s32.totalorder (!%p899_p1), %s2947_s7, 0 }
 0x125   : > { %921 = sbr.rel (%p1635_p2) target bundleno = 360 (0x168), region = 137  ;;  %s922_s12 = sshrl.u32 (!%p1635_p2), %s3427_s14, 3 }
 0x126   : > { %s2954_s13 = sshrl.u32 (!%p1635_p2), %s922_s12, 6 }
 0x127   : > { %p1636_p3 = scmp.le.s32.totalorder (!%p1635_p2), %s2954_s13, 0 }
 0x12c   : > { %1487 = sbr.rel (%p1636_p3) target bundleno = 340 (0x154), region = 312  ;;  %s3400_s25 = smov (!%p1636_p3), %s2940_s1 }
 0x12d   : > { %s3401_s18 = smov (!%p1636_p3), %s2472_s28  ;;  %s2963_s0 = smov (!%p1636_p3), 0  }
 0x12e   : > { %s2965_s11 = smov (!%p1636_p3), 0  }
 0x133 LB: >> { %v935_v37 = vld [vmem:[%s2259_s18] sm:$0xff]  ;;  %v937_v38 = vld [vmem:[%s2259_s18 + $0x8] sm:$0xff]  ;;  %v939_v39 = vld [vmem:[%s2259_s18 + $0x10] sm:$0xff]  ;;  %s1063_s17 = sadd.s32 1, %s2263_s0  ;;  %s929_s11 = sadd.s32 1, %s2267_s11   ;;  %s2267_s11 = sphi %s2965_s11, %s929_s11   ;;  %s2263_s0 = sphi %s2963_s0, %s3404_s0   ;;  %s2259_s18 = sphi %s3401_s18, %s3403_s18   ;;  %s2255_s25 = sphi %s3400_s25, %s3402_s25  }
 0x134   : >> { %936 = vst [vmem:[%s2255_s25] sm:$0xff] %v935_v37  ;;  %938 = vst [vmem:[%s2255_s25 + $0x8] sm:$0xff] %v937_v38  ;;  %v941_v40 = vld [vmem:[%s2259_s18 + $0x18] sm:$0xff]  ;;  %v943_v41 = vld [vmem:[%s2259_s18 + $0x20] sm:$0xff]  ;;  %p1064_p4 = scmp.ge.s32.totalorder %s1063_s17, %s2954_s13  ;;  %p928_p7 = scmp.ge.s32.totalorder %s929_s11, %s2954_s13 }
 0x135   : >> { %940 = vst [vmem:[%s2255_s25 + $0x10] sm:$0xff] %v939_v39  ;;  %v945_v42 = vld [vmem:[%s2259_s18 + $0x28] sm:$0xff]  ;;  %942 = vst [vmem:[%s2255_s25 + $0x18] sm:$0xff] %v941_v40  ;;  %v947_v43 = vld [vmem:[%s2259_s18 + $0x30] sm:$0xff] }
 0x136   : >> { %944 = vst [vmem:[%s2255_s25 + $0x20] sm:$0xff] %v943_v41  ;;  %946 = vst [vmem:[%s2255_s25 + $0x28] sm:$0xff] %v945_v42  ;;  %v949_v44 = vld [vmem:[%s2259_s18 + $0x38] sm:$0xff]  ;;  %v951_v45 = vld [vmem:[%s2259_s18 + $0x40] sm:$0xff]  ;;  %s3429_s17 = smov (%p1064_p4, %s1063_s17), 0 }
 0x137   : >> { %948 = vst [vmem:[%s2255_s25 + $0x30] sm:$0xff] %v947_v43  ;;  %950 = vst [vmem:[%s2255_s25 + $0x38] sm:$0xff] %v949_v44  ;;  %v953_v46 = vld [vmem:[%s2259_s18 + $0x48] sm:$0xff]  ;;  %v955_v47 = vld [vmem:[%s2259_s18 + $0x50] sm:$0xff]  ;;  %s1637_s15 = sshll.u32 %s3429_s17, 9  ;;  %s3404_s0 = smov %s3429_s17 }
 0x138   : >> { %952 = vst [vmem:[%s2255_s25 + $0x40] sm:$0xff] %v951_v45  ;;  %v957_v48 = vld [vmem:[%s2259_s18 + $0x58] sm:$0xff]  ;;  %954 = vst [vmem:[%s2255_s25 + $0x48] sm:$0xff] %v953_v46  ;;  %v959_v49 = vld [vmem:[%s2259_s18 + $0x60] sm:$0xff]  ;;  %s3021_s10 = scalar_lea.vmem %s2472_s28, %s1637_s15 [#allocation7]   ;;  %s3024_s26 = scalar_lea.vmem %s2940_s1, %s1637_s15  }
 0x139   : >> { %956 = vst [vmem:[%s2255_s25 + $0x50] sm:$0xff] %v955_v47  ;;  %958 = vst [vmem:[%s2255_s25 + $0x58] sm:$0xff] %v957_v48  ;;  %v961_v50 = vld [vmem:[%s2259_s18 + $0x68] sm:$0xff]  ;;  %v963_v51 = vld [vmem:[%s2259_s18 + $0x70] sm:$0xff] }
 0x13a   : >> { %960 = vst [vmem:[%s2255_s25 + $0x60] sm:$0xff] %v959_v49  ;;  %962 = vst [vmem:[%s2255_s25 + $0x68] sm:$0xff] %v961_v50  ;;  %v965_v52 = vld [vmem:[%s2259_s18 + $0x78] sm:$0xff]  ;;  %v967_v53 = vld [vmem:[%s2259_s18 + $0x80] sm:$0xff] }
 0x13b   : >> { %964 = vst [vmem:[%s2255_s25 + $0x70] sm:$0xff] %v963_v51  ;;  %v969_v54 = vld [vmem:[%s2259_s18 + $0x88] sm:$0xff]  ;;  %966 = vst [vmem:[%s2255_s25 + $0x78] sm:$0xff] %v965_v52  ;;  %v971_v55 = vld [vmem:[%s2259_s18 + $0x90] sm:$0xff] }
 0x13c   : >> { %968 = vst [vmem:[%s2255_s25 + $0x80] sm:$0xff] %v967_v53  ;;  %970 = vst [vmem:[%s2255_s25 + $0x88] sm:$0xff] %v969_v54  ;;  %v973_v56 = vld [vmem:[%s2259_s18 + $0x98] sm:$0xff]  ;;  %v975_v57 = vld [vmem:[%s2259_s18 + $0xa0] sm:$0xff] }
 0x13d   : >> { %972 = vst [vmem:[%s2255_s25 + $0x90] sm:$0xff] %v971_v55  ;;  %974 = vst [vmem:[%s2255_s25 + $0x98] sm:$0xff] %v973_v56  ;;  %v977_v58 = vld [vmem:[%s2259_s18 + $0xa8] sm:$0xff]  ;;  %v979_v59 = vld [vmem:[%s2259_s18 + $0xb0] sm:$0xff] }
 0x13e   : >> { %976 = vst [vmem:[%s2255_s25 + $0xa0] sm:$0xff] %v975_v57  ;;  %v981_v60 = vld [vmem:[%s2259_s18 + $0xb8] sm:$0xff]  ;;  %978 = vst [vmem:[%s2255_s25 + $0xa8] sm:$0xff] %v977_v58  ;;  %v983_v61 = vld [vmem:[%s2259_s18 + $0xc0] sm:$0xff] }
 0x13f   : >> { %980 = vst [vmem:[%s2255_s25 + $0xb0] sm:$0xff] %v979_v59  ;;  %982 = vst [vmem:[%s2255_s25 + $0xb8] sm:$0xff] %v981_v60  ;;  %v985_v62 = vld [vmem:[%s2259_s18 + $0xc8] sm:$0xff]  ;;  %v987_v63 = vld [vmem:[%s2259_s18 + $0xd0] sm:$0xff] }
 0x140   : >> { %984 = vst [vmem:[%s2255_s25 + $0xc0] sm:$0xff] %v983_v61  ;;  %986 = vst [vmem:[%s2255_s25 + $0xc8] sm:$0xff] %v985_v62  ;;  %v989_v0 = vld [vmem:[%s2259_s18 + $0xd8] sm:$0xff]  ;;  %v991_v1 = vld [vmem:[%s2259_s18 + $0xe0] sm:$0xff] }
 0x141   : >> { %988 = vst [vmem:[%s2255_s25 + $0xd0] sm:$0xff] %v987_v63  ;;  %v993_v2 = vld [vmem:[%s2259_s18 + $0xe8] sm:$0xff]  ;;  %990 = vst [vmem:[%s2255_s25 + $0xd8] sm:$0xff] %v989_v0  ;;  %v995_v3 = vld [vmem:[%s2259_s18 + $0xf0] sm:$0xff] }
 0x142   : >> { %992 = vst [vmem:[%s2255_s25 + $0xe0] sm:$0xff] %v991_v1  ;;  %994 = vst [vmem:[%s2255_s25 + $0xe8] sm:$0xff] %v993_v2  ;;  %v997_v4 = vld [vmem:[%s2259_s18 + $0xf8] sm:$0xff]  ;;  %v999_v5 = vld [vmem:[%s2259_s18 + $0x100] sm:$0xff] }
 0x143   : >> { %996 = vst [vmem:[%s2255_s25 + $0xf0] sm:$0xff] %v995_v3  ;;  %998 = vst [vmem:[%s2255_s25 + $0xf8] sm:$0xff] %v997_v4  ;;  %v1001_v6 = vld [vmem:[%s2259_s18 + $0x108] sm:$0xff]  ;;  %v1003_v7 = vld [vmem:[%s2259_s18 + $0x110] sm:$0xff] }
 0x144   : >> { %1000 = vst [vmem:[%s2255_s25 + $0x100] sm:$0xff] %v999_v5  ;;  %v1005_v8 = vld [vmem:[%s2259_s18 + $0x118] sm:$0xff]  ;;  %1002 = vst [vmem:[%s2255_s25 + $0x108] sm:$0xff] %v1001_v6  ;;  %v1007_v9 = vld [vmem:[%s2259_s18 + $0x120] sm:$0xff] }
 0x145   : >> { %1004 = vst [vmem:[%s2255_s25 + $0x110] sm:$0xff] %v1003_v7  ;;  %1006 = vst [vmem:[%s2255_s25 + $0x118] sm:$0xff] %v1005_v8  ;;  %v1009_v10 = vld [vmem:[%s2259_s18 + $0x128] sm:$0xff]  ;;  %v1011_v11 = vld [vmem:[%s2259_s18 + $0x130] sm:$0xff] }
 0x146   : >> { %1008 = vst [vmem:[%s2255_s25 + $0x120] sm:$0xff] %v1007_v9  ;;  %1010 = vst [vmem:[%s2255_s25 + $0x128] sm:$0xff] %v1009_v10  ;;  %v1013_v12 = vld [vmem:[%s2259_s18 + $0x138] sm:$0xff]  ;;  %v1015_v13 = vld [vmem:[%s2259_s18 + $0x140] sm:$0xff] }
 0x147   : >> { %1012 = vst [vmem:[%s2255_s25 + $0x130] sm:$0xff] %v1011_v11  ;;  %v1017_v14 = vld [vmem:[%s2259_s18 + $0x148] sm:$0xff]  ;;  %1014 = vst [vmem:[%s2255_s25 + $0x138] sm:$0xff] %v1013_v12  ;;  %v1019_v15 = vld [vmem:[%s2259_s18 + $0x150] sm:$0xff] }
 0x148   : >> { %1016 = vst [vmem:[%s2255_s25 + $0x140] sm:$0xff] %v1015_v13  ;;  %1018 = vst [vmem:[%s2255_s25 + $0x148] sm:$0xff] %v1017_v14  ;;  %v1021_v16 = vld [vmem:[%s2259_s18 + $0x158] sm:$0xff]  ;;  %v1023_v17 = vld [vmem:[%s2259_s18 + $0x160] sm:$0xff] }
 0x149   : >> { %1020 = vst [vmem:[%s2255_s25 + $0x150] sm:$0xff] %v1019_v15  ;;  %1022 = vst [vmem:[%s2255_s25 + $0x158] sm:$0xff] %v1021_v16  ;;  %v1025_v18 = vld [vmem:[%s2259_s18 + $0x168] sm:$0xff]  ;;  %v1027_v19 = vld [vmem:[%s2259_s18 + $0x170] sm:$0xff] }
 0x14a   : >> { %1024 = vst [vmem:[%s2255_s25 + $0x160] sm:$0xff] %v1023_v17  ;;  %v1029_v20 = vld [vmem:[%s2259_s18 + $0x178] sm:$0xff]  ;;  %1026 = vst [vmem:[%s2255_s25 + $0x168] sm:$0xff] %v1025_v18  ;;  %v1031_v21 = vld [vmem:[%s2259_s18 + $0x180] sm:$0xff] }
 0x14b   : >> { %1028 = vst [vmem:[%s2255_s25 + $0x170] sm:$0xff] %v1027_v19  ;;  %1030 = vst [vmem:[%s2255_s25 + $0x178] sm:$0xff] %v1029_v20  ;;  %v1033_v22 = vld [vmem:[%s2259_s18 + $0x188] sm:$0xff]  ;;  %v1035_v23 = vld [vmem:[%s2259_s18 + $0x190] sm:$0xff] }
 0x14c   : >> { %1032 = vst [vmem:[%s2255_s25 + $0x180] sm:$0xff] %v1031_v21  ;;  %1034 = vst [vmem:[%s2255_s25 + $0x188] sm:$0xff] %v1033_v22  ;;  %v1037_v24 = vld [vmem:[%s2259_s18 + $0x198] sm:$0xff]  ;;  %v1039_v25 = vld [vmem:[%s2259_s18 + $0x1a0] sm:$0xff] }
 0x14d   : >> { %1036 = vst [vmem:[%s2255_s25 + $0x190] sm:$0xff] %v1035_v23  ;;  %v1041_v26 = vld [vmem:[%s2259_s18 + $0x1a8] sm:$0xff]  ;;  %1038 = vst [vmem:[%s2255_s25 + $0x198] sm:$0xff] %v1037_v24  ;;  %v1043_v27 = vld [vmem:[%s2259_s18 + $0x1b0] sm:$0xff]  ;;  %931 = sbr.rel (!%p928_p7) target bundleno = 307 (0x133), region = 318 }
 0x14e   : >> { %1040 = vst [vmem:[%s2255_s25 + $0x1a0] sm:$0xff] %v1039_v25  ;;  %1042 = vst [vmem:[%s2255_s25 + $0x1a8] sm:$0xff] %v1041_v26  ;;  %v1045_v28 = vld [vmem:[%s2259_s18 + $0x1b8] sm:$0xff]  ;;  %v1047_v29 = vld [vmem:[%s2259_s18 + $0x1c0] sm:$0xff] }
 0x14f   : >> { %1044 = vst [vmem:[%s2255_s25 + $0x1b0] sm:$0xff] %v1043_v27  ;;  %1046 = vst [vmem:[%s2255_s25 + $0x1b8] sm:$0xff] %v1045_v28  ;;  %v1049_v30 = vld [vmem:[%s2259_s18 + $0x1c8] sm:$0xff]  ;;  %v1051_v31 = vld [vmem:[%s2259_s18 + $0x1d0] sm:$0xff] }
 0x150   : >> { %1048 = vst [vmem:[%s2255_s25 + $0x1c0] sm:$0xff] %v1047_v29  ;;  %v1053_v32 = vld [vmem:[%s2259_s18 + $0x1d8] sm:$0xff]  ;;  %1050 = vst [vmem:[%s2255_s25 + $0x1c8] sm:$0xff] %v1049_v30  ;;  %v1055_v33 = vld [vmem:[%s2259_s18 + $0x1e0] sm:$0xff] }
 0x151   : >> { %1052 = vst [vmem:[%s2255_s25 + $0x1d0] sm:$0xff] %v1051_v31  ;;  %1054 = vst [vmem:[%s2255_s25 + $0x1d8] sm:$0xff] %v1053_v32  ;;  %v1057_v34 = vld [vmem:[%s2259_s18 + $0x1e8] sm:$0xff]  ;;  %v1059_v35 = vld [vmem:[%s2259_s18 + $0x1f0] sm:$0xff] }
 0x152   : >> { %1056 = vst [vmem:[%s2255_s25 + $0x1e0] sm:$0xff] %v1055_v33  ;;  %1058 = vst [vmem:[%s2255_s25 + $0x1e8] sm:$0xff] %v1057_v34  ;;  %v1061_v36 = vld [vmem:[%s2259_s18 + $0x1f8] sm:$0xff]  ;;  %s3403_s18 = smov %s3021_s10 }
 0x153   : >> { %1060 = vst [vmem:[%s2255_s25 + $0x1f0] sm:$0xff] %v1059_v35  ;;  %1062 = vst [vmem:[%s2255_s25 + $0x1f8] sm:$0xff] %v1061_v36  ;;  %s3402_s25 = smov %s3024_s26 }
 0x154 PF: > { %s3130_s2 = sand.u32 63, %s922_s12   ;;  %s1662_s3 = sshll.u32 %s2954_s13, 13 }
 0x155   : > { %s1074_s16 = sshra.s32 %s1662_s3, 4  ;;  %p1642_p8 = scmp.le.s32.totalorder %s3130_s2, 0 }
 0x156   : > { %s1075_s20 = scalar_lea.vmem %s2472_s28, %s1074_s16 [#allocation7]   ;;  %s1078_s4 = scalar_lea.vmem %s2940_s1, %s1074_s16  }
 0x157   : > { %1501 = sbr.rel (%p1642_p8) target bundleno = 360 (0x168), region = 323  ;;  %s2269_s9 = smov (!%p1642_p8), %s1078_s4  }
 0x158   : > { %s2273_s29 = smov (!%p1642_p8), %s1075_s20   ;;  %s2277_s19 = smov (!%p1642_p8), 0  }
 0x159   : > { %s2281_s11 = smov (!%p1642_p8), 0  }
 0x15e LB: >> { %v1090_v37 = vld [vmem:[%s2275_s29] sm:$0xff]  ;;  %s1092_s12 = sadd.s32 1, %s2279_s19  ;;  %s1084_s11 = sadd.s32 1, %s2283_s11   ;;  %s2283_s11 = sphi %s2281_s11, %s1084_s11   ;;  %s2279_s19 = sphi %s2277_s19, %s2278_s19   ;;  %s2275_s29 = sphi %s2273_s29, %s1097_s29   ;;  %s2271_s9 = sphi %s2269_s9, %s1098_s9  }
 0x15f   : >> { %1091 = vst [vmem:[%s2271_s9] sm:$0xff] %v1090_v37  ;;  %p1093_p13 = scmp.ge.s32.totalorder %s1092_s12, %s3130_s2  ;;  %p1083_p10 = scmp.ge.s32.totalorder %s1084_s11, %s3130_s2 }
 0x161   : >> { %s3431_s12 = smov (%p1093_p13, %s1092_s12), 0  ;;  %1086 = sbr.rel (!%p1083_p10) target bundleno = 350 (0x15e), region = 329 }
 0x162   : >> { %s1643_s13 = sshll.u32 %s3431_s12, 3  ;;  %s2278_s19 = smov %s3431_s12  }
 0x163   : >> { %s1097_s29 = scalar_lea.vmem %s1075_s20, %s1643_s13 [#allocation7]   ;;  %s1098_s9 = scalar_lea.vmem %s1078_s4, %s1643_s13  }
 0x168 PF: > { %1101 = sbr.rel (%p918_p5) target bundleno = 431 (0x1af), region = 155  ;;  %s3142_s25 = ssub.s32 (!%p918_p5), %s3427_s14, %s2947_s7 }
 0x169   : > { %s1107_s18 = sshrl.u32 (!%p918_p5), %s3427_s14, 3  ;;  %s1104_s0 = scalar_lea.vmem (!%p918_p5), %s2472_s28, %s3142_s25 [#allocation7] }
 0x16a   : > { %s1106_s17 = scalar_lea.vmem (!%p918_p5), %s2940_s1, %s3142_s25  ;;  %s3151_s15 = sshrl.u32 (!%p918_p5), %s1107_s18, 6 }
 0x16b   : > { %p1645_p9 = scmp.le.s32.totalorder (!%p918_p5), %s3151_s15, 0 }
 0x16f   : > { %1515 = sbr.rel (%p1645_p9) target bundleno = 407 (0x197), region = 334  ;;  %s3405_s10 = smov (!%p1645_p9), %s2940_s1 }
 0x170   : > { %s3406_s26 = smov (!%p1645_p9), %s2472_s28  ;;  %s3160_s2 = smov (!%p1645_p9), 0  }
 0x171   : > { %s3162_s3 = smov (!%p1645_p9), 0  }
 0x176 LB: >> { %v1120_v38 = vld [vmem:[%s2291_s26] sm:$0xff]  ;;  %v1122_v39 = vld [vmem:[%s2291_s26 + $0x8] sm:$0xff]  ;;  %v1124_v40 = vld [vmem:[%s2291_s26 + $0x10] sm:$0xff]  ;;  %s1248_s16 = sadd.s32 1, %s2295_s2  ;;  %s1114_s3 = sadd.s32 1, %s2299_s3   ;;  %s2299_s3 = sphi %s3162_s3, %s1114_s3   ;;  %s2295_s2 = sphi %s3160_s2, %s3409_s2   ;;  %s2291_s26 = sphi %s3406_s26, %s3408_s26   ;;  %s2287_s10 = sphi %s3405_s10, %s3407_s10  }
 0x177   : >> { %1121 = vst [vmem:[%s2287_s10] sm:$0xff] %v1120_v38  ;;  %1123 = vst [vmem:[%s2287_s10 + $0x8] sm:$0xff] %v1122_v39  ;;  %v1126_v41 = vld [vmem:[%s2291_s26 + $0x18] sm:$0xff]  ;;  %v1128_v42 = vld [vmem:[%s2291_s26 + $0x20] sm:$0xff]  ;;  %p1249_p11 = scmp.ge.s32.totalorder %s1248_s16, %s3151_s15  ;;  %p1113_p12 = scmp.ge.s32.totalorder %s1114_s3, %s3151_s15 }
 0x178   : >> { %1125 = vst [vmem:[%s2287_s10 + $0x10] sm:$0xff] %v1124_v40  ;;  %v1130_v43 = vld [vmem:[%s2291_s26 + $0x28] sm:$0xff]  ;;  %1127 = vst [vmem:[%s2287_s10 + $0x18] sm:$0xff] %v1126_v41  ;;  %v1132_v44 = vld [vmem:[%s2291_s26 + $0x30] sm:$0xff] }
 0x179   : >> { %1129 = vst [vmem:[%s2287_s10 + $0x20] sm:$0xff] %v1128_v42  ;;  %1131 = vst [vmem:[%s2287_s10 + $0x28] sm:$0xff] %v1130_v43  ;;  %v1134_v45 = vld [vmem:[%s2291_s26 + $0x38] sm:$0xff]  ;;  %v1136_v46 = vld [vmem:[%s2291_s26 + $0x40] sm:$0xff]  ;;  %s3433_s16 = smov (%p1249_p11, %s1248_s16), 0 }
 0x17a   : >> { %1133 = vst [vmem:[%s2287_s10 + $0x30] sm:$0xff] %v1132_v44  ;;  %1135 = vst [vmem:[%s2287_s10 + $0x38] sm:$0xff] %v1134_v45  ;;  %v1138_v47 = vld [vmem:[%s2291_s26 + $0x48] sm:$0xff]  ;;  %v1140_v48 = vld [vmem:[%s2291_s26 + $0x50] sm:$0xff]  ;;  %s1646_s20 = sshll.u32 %s3433_s16, 9  ;;  %s3409_s2 = smov %s3433_s16 }
 0x17b   : >> { %1137 = vst [vmem:[%s2287_s10 + $0x40] sm:$0xff] %v1136_v46  ;;  %v1142_v49 = vld [vmem:[%s2291_s26 + $0x58] sm:$0xff]  ;;  %1139 = vst [vmem:[%s2287_s10 + $0x48] sm:$0xff] %v1138_v47  ;;  %v1144_v50 = vld [vmem:[%s2291_s26 + $0x60] sm:$0xff]  ;;  %s3218_s4 = scalar_lea.vmem %s2472_s28, %s1646_s20 [#allocation7]   ;;  %s3221_s9 = scalar_lea.vmem %s2940_s1, %s1646_s20  }
 0x17c   : >> { %1141 = vst [vmem:[%s2287_s10 + $0x50] sm:$0xff] %v1140_v48  ;;  %1143 = vst [vmem:[%s2287_s10 + $0x58] sm:$0xff] %v1142_v49  ;;  %v1146_v51 = vld [vmem:[%s2291_s26 + $0x68] sm:$0xff]  ;;  %v1148_v52 = vld [vmem:[%s2291_s26 + $0x70] sm:$0xff] }
 0x17d   : >> { %1145 = vst [vmem:[%s2287_s10 + $0x60] sm:$0xff] %v1144_v50  ;;  %1147 = vst [vmem:[%s2287_s10 + $0x68] sm:$0xff] %v1146_v51  ;;  %v1150_v53 = vld [vmem:[%s2291_s26 + $0x78] sm:$0xff]  ;;  %v1152_v54 = vld [vmem:[%s2291_s26 + $0x80] sm:$0xff] }
 0x17e   : >> { %1149 = vst [vmem:[%s2287_s10 + $0x70] sm:$0xff] %v1148_v52  ;;  %v1154_v55 = vld [vmem:[%s2291_s26 + $0x88] sm:$0xff]  ;;  %1151 = vst [vmem:[%s2287_s10 + $0x78] sm:$0xff] %v1150_v53  ;;  %v1156_v56 = vld [vmem:[%s2291_s26 + $0x90] sm:$0xff] }
 0x17f   : >> { %1153 = vst [vmem:[%s2287_s10 + $0x80] sm:$0xff] %v1152_v54  ;;  %1155 = vst [vmem:[%s2287_s10 + $0x88] sm:$0xff] %v1154_v55  ;;  %v1158_v57 = vld [vmem:[%s2291_s26 + $0x98] sm:$0xff]  ;;  %v1160_v58 = vld [vmem:[%s2291_s26 + $0xa0] sm:$0xff] }
 0x180   : >> { %1157 = vst [vmem:[%s2287_s10 + $0x90] sm:$0xff] %v1156_v56  ;;  %1159 = vst [vmem:[%s2287_s10 + $0x98] sm:$0xff] %v1158_v57  ;;  %v1162_v59 = vld [vmem:[%s2291_s26 + $0xa8] sm:$0xff]  ;;  %v1164_v60 = vld [vmem:[%s2291_s26 + $0xb0] sm:$0xff] }
 0x181   : >> { %1161 = vst [vmem:[%s2287_s10 + $0xa0] sm:$0xff] %v1160_v58  ;;  %v1166_v61 = vld [vmem:[%s2291_s26 + $0xb8] sm:$0xff]  ;;  %1163 = vst [vmem:[%s2287_s10 + $0xa8] sm:$0xff] %v1162_v59  ;;  %v1168_v62 = vld [vmem:[%s2291_s26 + $0xc0] sm:$0xff] }
 0x182   : >> { %1165 = vst [vmem:[%s2287_s10 + $0xb0] sm:$0xff] %v1164_v60  ;;  %1167 = vst [vmem:[%s2287_s10 + $0xb8] sm:$0xff] %v1166_v61  ;;  %v1170_v63 = vld [vmem:[%s2291_s26 + $0xc8] sm:$0xff]  ;;  %v1172_v0 = vld [vmem:[%s2291_s26 + $0xd0] sm:$0xff] }
 0x183   : >> { %1169 = vst [vmem:[%s2287_s10 + $0xc0] sm:$0xff] %v1168_v62  ;;  %1171 = vst [vmem:[%s2287_s10 + $0xc8] sm:$0xff] %v1170_v63  ;;  %v1174_v1 = vld [vmem:[%s2291_s26 + $0xd8] sm:$0xff]  ;;  %v1176_v2 = vld [vmem:[%s2291_s26 + $0xe0] sm:$0xff] }
 0x184   : >> { %1173 = vst [vmem:[%s2287_s10 + $0xd0] sm:$0xff] %v1172_v0  ;;  %v1178_v3 = vld [vmem:[%s2291_s26 + $0xe8] sm:$0xff]  ;;  %1175 = vst [vmem:[%s2287_s10 + $0xd8] sm:$0xff] %v1174_v1  ;;  %v1180_v4 = vld [vmem:[%s2291_s26 + $0xf0] sm:$0xff] }
 0x185   : >> { %1177 = vst [vmem:[%s2287_s10 + $0xe0] sm:$0xff] %v1176_v2  ;;  %1179 = vst [vmem:[%s2287_s10 + $0xe8] sm:$0xff] %v1178_v3  ;;  %v1182_v5 = vld [vmem:[%s2291_s26 + $0xf8] sm:$0xff]  ;;  %v1184_v6 = vld [vmem:[%s2291_s26 + $0x100] sm:$0xff] }
 0x186   : >> { %1181 = vst [vmem:[%s2287_s10 + $0xf0] sm:$0xff] %v1180_v4  ;;  %1183 = vst [vmem:[%s2287_s10 + $0xf8] sm:$0xff] %v1182_v5  ;;  %v1186_v7 = vld [vmem:[%s2291_s26 + $0x108] sm:$0xff]  ;;  %v1188_v8 = vld [vmem:[%s2291_s26 + $0x110] sm:$0xff] }
 0x187   : >> { %1185 = vst [vmem:[%s2287_s10 + $0x100] sm:$0xff] %v1184_v6  ;;  %v1190_v9 = vld [vmem:[%s2291_s26 + $0x118] sm:$0xff]  ;;  %1187 = vst [vmem:[%s2287_s10 + $0x108] sm:$0xff] %v1186_v7  ;;  %v1192_v10 = vld [vmem:[%s2291_s26 + $0x120] sm:$0xff] }
 0x188   : >> { %1189 = vst [vmem:[%s2287_s10 + $0x110] sm:$0xff] %v1188_v8  ;;  %1191 = vst [vmem:[%s2287_s10 + $0x118] sm:$0xff] %v1190_v9  ;;  %v1194_v11 = vld [vmem:[%s2291_s26 + $0x128] sm:$0xff]  ;;  %v1196_v12 = vld [vmem:[%s2291_s26 + $0x130] sm:$0xff] }
 0x189   : >> { %1193 = vst [vmem:[%s2287_s10 + $0x120] sm:$0xff] %v1192_v10  ;;  %1195 = vst [vmem:[%s2287_s10 + $0x128] sm:$0xff] %v1194_v11  ;;  %v1198_v13 = vld [vmem:[%s2291_s26 + $0x138] sm:$0xff]  ;;  %v1200_v14 = vld [vmem:[%s2291_s26 + $0x140] sm:$0xff] }
 0x18a   : >> { %1197 = vst [vmem:[%s2287_s10 + $0x130] sm:$0xff] %v1196_v12  ;;  %v1202_v15 = vld [vmem:[%s2291_s26 + $0x148] sm:$0xff]  ;;  %1199 = vst [vmem:[%s2287_s10 + $0x138] sm:$0xff] %v1198_v13  ;;  %v1204_v16 = vld [vmem:[%s2291_s26 + $0x150] sm:$0xff] }
 0x18b   : >> { %1201 = vst [vmem:[%s2287_s10 + $0x140] sm:$0xff] %v1200_v14  ;;  %1203 = vst [vmem:[%s2287_s10 + $0x148] sm:$0xff] %v1202_v15  ;;  %v1206_v17 = vld [vmem:[%s2291_s26 + $0x158] sm:$0xff]  ;;  %v1208_v18 = vld [vmem:[%s2291_s26 + $0x160] sm:$0xff] }
 0x18c   : >> { %1205 = vst [vmem:[%s2287_s10 + $0x150] sm:$0xff] %v1204_v16  ;;  %1207 = vst [vmem:[%s2287_s10 + $0x158] sm:$0xff] %v1206_v17  ;;  %v1210_v19 = vld [vmem:[%s2291_s26 + $0x168] sm:$0xff]  ;;  %v1212_v20 = vld [vmem:[%s2291_s26 + $0x170] sm:$0xff] }
 0x18d   : >> { %1209 = vst [vmem:[%s2287_s10 + $0x160] sm:$0xff] %v1208_v18  ;;  %v1214_v21 = vld [vmem:[%s2291_s26 + $0x178] sm:$0xff]  ;;  %1211 = vst [vmem:[%s2287_s10 + $0x168] sm:$0xff] %v1210_v19  ;;  %v1216_v22 = vld [vmem:[%s2291_s26 + $0x180] sm:$0xff] }
 0x18e   : >> { %1213 = vst [vmem:[%s2287_s10 + $0x170] sm:$0xff] %v1212_v20  ;;  %1215 = vst [vmem:[%s2287_s10 + $0x178] sm:$0xff] %v1214_v21  ;;  %v1218_v23 = vld [vmem:[%s2291_s26 + $0x188] sm:$0xff]  ;;  %v1220_v24 = vld [vmem:[%s2291_s26 + $0x190] sm:$0xff] }
 0x18f   : >> { %1217 = vst [vmem:[%s2287_s10 + $0x180] sm:$0xff] %v1216_v22  ;;  %1219 = vst [vmem:[%s2287_s10 + $0x188] sm:$0xff] %v1218_v23  ;;  %v1222_v25 = vld [vmem:[%s2291_s26 + $0x198] sm:$0xff]  ;;  %v1224_v26 = vld [vmem:[%s2291_s26 + $0x1a0] sm:$0xff] }
 0x190   : >> { %1221 = vst [vmem:[%s2287_s10 + $0x190] sm:$0xff] %v1220_v24  ;;  %v1226_v27 = vld [vmem:[%s2291_s26 + $0x1a8] sm:$0xff]  ;;  %1223 = vst [vmem:[%s2287_s10 + $0x198] sm:$0xff] %v1222_v25  ;;  %v1228_v28 = vld [vmem:[%s2291_s26 + $0x1b0] sm:$0xff]  ;;  %1116 = sbr.rel (!%p1113_p12) target bundleno = 374 (0x176), region = 340 }
 0x191   : >> { %1225 = vst [vmem:[%s2287_s10 + $0x1a0] sm:$0xff] %v1224_v26  ;;  %1227 = vst [vmem:[%s2287_s10 + $0x1a8] sm:$0xff] %v1226_v27  ;;  %v1230_v29 = vld [vmem:[%s2291_s26 + $0x1b8] sm:$0xff]  ;;  %v1232_v30 = vld [vmem:[%s2291_s26 + $0x1c0] sm:$0xff] }
 0x192   : >> { %1229 = vst [vmem:[%s2287_s10 + $0x1b0] sm:$0xff] %v1228_v28  ;;  %1231 = vst [vmem:[%s2287_s10 + $0x1b8] sm:$0xff] %v1230_v29  ;;  %v1234_v31 = vld [vmem:[%s2291_s26 + $0x1c8] sm:$0xff]  ;;  %v1236_v32 = vld [vmem:[%s2291_s26 + $0x1d0] sm:$0xff] }
 0x193   : >> { %1233 = vst [vmem:[%s2287_s10 + $0x1c0] sm:$0xff] %v1232_v30  ;;  %v1238_v33 = vld [vmem:[%s2291_s26 + $0x1d8] sm:$0xff]  ;;  %1235 = vst [vmem:[%s2287_s10 + $0x1c8] sm:$0xff] %v1234_v31  ;;  %v1240_v34 = vld [vmem:[%s2291_s26 + $0x1e0] sm:$0xff] }
 0x194   : >> { %1237 = vst [vmem:[%s2287_s10 + $0x1d0] sm:$0xff] %v1236_v32  ;;  %1239 = vst [vmem:[%s2287_s10 + $0x1d8] sm:$0xff] %v1238_v33  ;;  %v1242_v35 = vld [vmem:[%s2291_s26 + $0x1e8] sm:$0xff]  ;;  %v1244_v36 = vld [vmem:[%s2291_s26 + $0x1f0] sm:$0xff] }
 0x195   : >> { %1241 = vst [vmem:[%s2287_s10 + $0x1e0] sm:$0xff] %v1240_v34  ;;  %1243 = vst [vmem:[%s2287_s10 + $0x1e8] sm:$0xff] %v1242_v35  ;;  %v1246_v37 = vld [vmem:[%s2291_s26 + $0x1f8] sm:$0xff]  ;;  %s3408_s26 = smov %s3218_s4 }
 0x196   : >> { %1245 = vst [vmem:[%s2287_s10 + $0x1f0] sm:$0xff] %v1244_v36  ;;  %1247 = vst [vmem:[%s2287_s10 + $0x1f8] sm:$0xff] %v1246_v37  ;;  %s3407_s10 = smov %s3221_s9 }
 0x197 PF: > { %s3327_s29 = sand.u32 63, %s1107_s18   ;;  %s1664_s19 = sshll.u32 %s3151_s15, 13 }
 0x198   : > { %s1259_s11 = sshra.s32 %s1664_s19, 4  ;;  %p1651_p0 = scmp.le.s32.totalorder %s3327_s29, 0 }
 0x199   : > { %s1260_s12 = scalar_lea.vmem %s2472_s28, %s1259_s11 [#allocation7]   ;;  %s1263_s13 = scalar_lea.vmem %s2940_s1, %s1259_s11  }
 0x19a   : > { %1529 = sbr.rel (%p1651_p0) target bundleno = 427 (0x1ab), region = 345  ;;  %s2301_s20 = smov (!%p1651_p0), %s1263_s13  }
 0x19b   : > { %s2305_s16 = smov (!%p1651_p0), %s1260_s12   ;;  %s2309_s4 = smov (!%p1651_p0), 0  }
 0x19c   : > { %s2313_s3 = smov (!%p1651_p0), 0  }
 0x1a1 LB: >> { %v1275_v38 = vld [vmem:[%s2307_s16] sm:$0xff]  ;;  %s1277_s18 = sadd.s32 1, %s2311_s4  ;;  %s1269_s3 = sadd.s32 1, %s2315_s3   ;;  %s2315_s3 = sphi %s2313_s3, %s1269_s3   ;;  %s2311_s4 = sphi %s2309_s4, %s2310_s4   ;;  %s2307_s16 = sphi %s2305_s16, %s1282_s16   ;;  %s2303_s20 = sphi %s2301_s20, %s1283_s20  }
 0x1a2   : >> { %1276 = vst [vmem:[%s2303_s20] sm:$0xff] %v1275_v38  ;;  %p1278_p1 = scmp.ge.s32.totalorder %s1277_s18, %s3327_s29  ;;  %p1268_p5 = scmp.ge.s32.totalorder %s1269_s3, %s3327_s29 }
 0x1a4   : >> { %s3435_s18 = smov (%p1278_p1, %s1277_s18), 0  ;;  %1271 = sbr.rel (!%p1268_p5) target bundleno = 417 (0x1a1), region = 351 }
 0x1a5   : >> { %s1652_s15 = sshll.u32 %s3435_s18, 3  ;;  %s2310_s4 = smov %s3435_s18  }
 0x1a6   : >> { %s1282_s16 = scalar_lea.vmem %s1260_s12, %s1652_s15 [#allocation7]   ;;  %s1283_s20 = scalar_lea.vmem %s1263_s13, %s1652_s15  }
 0x1ab PF: > { %s2321_s10 = smov 0  }
 0x1ac   : > { %s1284_s26 = sshllo.u32 %s2321_s10, %s2947_s7 }
 0x1ad   : > { %v1293_v39 = vld [vmem:[%s1104_s0] sm:%s1284_s26] }
 0x1ae   : > { %1294 = vst [vmem:[%s1106_s17] sm:%s1284_s26] %v1293_v39 }
 0x1af PF: > { %p1654_p2 = scmp.ge.u32.totalorder %s3427_s14, 8 }
 0x1b0   : > { %s2322_s2 = smov (!%p1654_p2), 0  }
 0x1b1   : > { %905 = sbr.rel (%p1654_p2) target bundleno = 440 (0x1b8), region = 126  ;;  %s906_s9 = sshllo.u32 (!%p1654_p2), %s2322_s2, %s3427_s14 }
 0x1b2   : > { %v915_v40 = vld [vmem:[%s2472_s28] sm:%s906_s9] (!%p1654_p2) }
 0x1b3   : > { %916 = vst [vmem:[%s2940_s1] sm:%s906_s9] (!%p1654_p2), %v915_v40 }
 0x1b8 PF: > { %p1684_p3 = scmp.ge.s32.totalorder %s2187_s24, 2  ;;  %s1304_s7 = sand.u32 1, %s2175_s21  }
 0x1b9   : > { %s1305_s25 = scalar_lea.sflag [#allocation3], %s1304_s7 }
 0x1ba   : > { %p1679_p4 = pnand %p1684_p3, %p2400_p6 }
 0x1bc   : > { %2170 = dma.done.wait (!%p1679_p4), %s1305_s25, 144  }
 0x1bd   : > { %2172 = vsyncadd (!%p1679_p4), %s1305_s25, 4294967152  ;;  %p18_p7 = scmp.ge.s32.totalorder %s2383_s27, 6   ;;  %s3410_s21 = smov %s2179_s22 }
 0x1be   : > { %s3411_s22 = smov %s2183_s23  ;;  %s3412_s23 = smov %s2394_s30 }
 0x1bf   : > { %s3413_s24 = smov %s2383_s27  ;;  %20 = sbr.rel (!%p18_p7) target bundleno = 10 (0xa), region = 362 }
 0x1c6   :  { %1324 = vsyncpa [#allocation3], 1 }
 0x1c7   :  { %1326 = vsyncpa [#allocation3 + $0x1], 1 }
 0x1c8   :  { %1327 = vsyncpa [#allocation4], 1 }
 0x1c9   :  { %1329 = vsyncpa [#allocation4 + $0x1], 1 }

</bundles_post_ra>
